<compile_context>
chip_gen: v7x
topology: tpu7x:2x2x1
jax: 0.10.0
libtpu: 0.0.40
codegen_flags: <defaults>
</compile_context>

<pallas_src>
import functools

import jax
import jax.numpy as jnp
from jax.experimental import pallas as pl
from jax.experimental.pallas import tpu as pltpu


def self_attn_kernel(x_ref, wq_ref, bq_ref, wk_ref, bk_ref, wv_ref, bv_ref,
                     gamma_ref, out_ref, attn_ref, k_sc, v_sc,
                     *, block_q, approx_recip):
    """One (batch, query-tile) grid step, channel-major layout.

    x_ref   : (C, N)      input slab for this batch element (resident)
    wq/wk   : (Cqp, C)    row-padded (out, in) projection weights
    wv      : (C, C)      (in, out) value weights
    out_ref : (C, TQ)     output tile (lane-dense)
    attn_ref: (TQ, N)     attention tile (lane-dense)
    k_sc    : (Cqp, N)    per-batch K cache (channel-major)
    v_sc    : (N, C)      per-batch V cache (token-major)
    """
    qi = pl.program_id(1)

    # ---- per-batch K / V projections, computed once (qi == 0) into scratch ----
    @pl.when(qi == 0)
    def _compute_kv():
        x = x_ref[...]                                                   # (C, N)
        k = jnp.dot(wk_ref[...], x,
                    preferred_element_type=jnp.float32) + bk_ref[...]    # (Cqp, N)
        k_sc[...] = k.astype(k_sc.dtype)
        # V token-major: contract the channel dim of x with the in-dim of Wv.
        v = jax.lax.dot_general(x, wv_ref[...], (((0,), (0,)), ((), ())),
                                preferred_element_type=jnp.float32)      # (N, C)
        v_sc[...] = (v + bv_ref[...]).astype(v_sc.dtype)

    # ---- per-tile Q projection on a lane slice of the resident x ----
    col0 = pl.multiple_of(qi * block_q, block_q)
    xq = x_ref[:, pl.ds(col0, block_q)]                                  # (C, TQ)
    q = jnp.dot(wq_ref[...], xq,
                preferred_element_type=jnp.float32) + bq_ref[...]        # (Cqp, TQ)
    q = q.astype(k_sc.dtype)

    # energy[i, j] = sum_c q[c, i] * k[c, j]  -> contract dim 0 of both
    # (tiny lhs; no materialized transpose of the big K operand).
    energy = jax.lax.dot_general(q, k_sc[...], (((0,), (0,)), ((), ())),
                                 preferred_element_type=jnp.float32)     # (TQ, N)

    # Row softmax in f32 (matches nn.Softmax(dim=-1)).
    m = jnp.max(energy, axis=-1, keepdims=True)
    e = jnp.exp(energy - m)
    denom = jnp.sum(e, axis=-1, keepdims=True)
    attn = e * pl.reciprocal(denom, approx=approx_recip)                 # (TQ, N)
    attn_ref[...] = attn

    # out[c, i] = sum_j v[c, j] * attn[i, j]:
    # MXU-native as (attn @ V_token_major) -> (TQ, C), then a small transpose.
    o_t = jnp.dot(attn.astype(v_sc.dtype), v_sc[...],
                  preferred_element_type=jnp.float32)                    # (TQ, C)
    gamma = gamma_ref[0, 0]
    out_ref[...] = gamma * o_t.T + xq.astype(jnp.float32)                # (C, TQ)


def self_attn_forward(x_nchw, params, *, block_q=None,
                      compute_dtype=jnp.float32, approx_recip=False):
    """x_nchw: (B, C, W, H) float32. Returns (out (B,C,W,H), attention (B,N,N)).

    For real-HW perf runs, set compute_dtype=jnp.bfloat16 and approx_recip=True
    (bf16 MXU inputs with f32 accumulation; EUP approximate reciprocal for the
    softmax denominator).  Defaults are the exact f32 path, which runs on every
    backend including the interpret-mode CPU executor.
    """
    B, C, W, H = x_nchw.shape
    N = W * H
    Cq = C // 8
    assert Cq >= 1, "in_dim must be >= 8"
    Cqp = max(8, ((Cq + 7) // 8) * 8)          # pad q/k channel dim to sublane mult

    # NCHW -> (B, C, N): pure reshape, no HBM transpose.
    x_bcn = x_nchw.reshape(B, C, N).astype(compute_dtype)

    # Query-row tile size.  Cap at 256 so double-buffered (TQ, N) tiles +
    # intermediates stay under ~32 MiB at SAGAN-scale N (v7x-safe); bump on
    # v6e/v5e if profiling says DMA is exposed.
    if block_q is None:
        block_q = next((t for t in (256, 128) if N % t == 0), N)
    TQ = block_q
    assert N % TQ == 0, "block_q must divide N = W*H"
    if TQ != N:
        assert TQ % 128 == 0, "block_q must be a multiple of 128 unless == N"
    n_q = N // TQ

    # Zero-pad Wq/Wk (and biases) to Cqp rows: padded rows contribute 0 to the
    # q·k contraction, so the energy is unchanged.
    def pad_qk(w, b):
        wp = jnp.zeros((Cqp, C), jnp.float32).at[:Cq].set(w.astype(jnp.float32))
        bp = jnp.zeros((Cqp, 1), jnp.float32).at[:Cq, 0].set(b.astype(jnp.float32))
        return wp.astype(compute_dtype), bp

    wq_p, bq_p = pad_qk(params["wq"], params["bq"])
    wk_p, bk_p = pad_qk(params["wk"], params["bk"])
    wv_io = params["wv"].T.astype(jnp.float32).astype(compute_dtype)   # (C_in, C_out)
    bv_r = params["bv"].reshape(1, C).astype(jnp.float32)
    gamma = params["gamma"].reshape(1, 1).astype(jnp.float32)

    kernel = functools.partial(self_attn_kernel, block_q=TQ,
                               approx_recip=approx_recip)

    out_bcn, attn = pl.pallas_call(
        kernel,
        out_shape=(
            jax.ShapeDtypeStruct((B, C, N), jnp.float32),
            jax.ShapeDtypeStruct((B, N, N), jnp.float32),
        ),
        grid_spec=pltpu.PrefetchScalarGridSpec(
            num_scalar_prefetch=0,
            grid=(B, n_q),
            in_specs=[
                # x: full (C, N) slab, constant over the q-tile axis -> fetched
                # once per batch element and kept resident.
                pl.BlockSpec((None, C, N), lambda b, q: (b, 0, 0)),
                pl.BlockSpec((Cqp, C), lambda b, q: (0, 0)),   # Wq (padded)
                pl.BlockSpec((Cqp, 1), lambda b, q: (0, 0)),   # bq (padded)
                pl.BlockSpec((Cqp, C), lambda b, q: (0, 0)),   # Wk (padded)
                pl.BlockSpec((Cqp, 1), lambda b, q: (0, 0)),   # bk (padded)
                pl.BlockSpec((C, C), lambda b, q: (0, 0)),     # Wv (in, out)
                pl.BlockSpec((1, C), lambda b, q: (0, 0)),     # bv
                # gamma: scalar in SMEM (scalar-slot read, no padded vector load).
                pl.BlockSpec((1, 1), lambda b, q: (0, 0),
                             memory_space=pltpu.MemorySpace.SMEM),
            ],
            out_specs=[
                pl.BlockSpec((None, C, TQ), lambda b, q: (b, 0, q)),   # out tile
                pl.BlockSpec((None, TQ, N), lambda b, q: (b, q, 0)),   # attn tile
            ],
            scratch_shapes=[
                pltpu.VMEM((Cqp, N), compute_dtype),   # K cache (channel-major)
                pltpu.VMEM((N, C), compute_dtype),     # V cache (token-major)
            ],
        ),
        compiler_params=pltpu.CompilerParams(
            dimension_semantics=("parallel", "arbitrary"),
            vmem_limit_bytes=48 * 1024 * 1024,
        ),
    )(x_bcn, wq_p, bq_p, wk_p, bk_p, wv_io, bv_r, gamma)

    return out_bcn.reshape(B, C, W, H), attn


def init_params(key, C):
    """Parameters in PyTorch layout: conv weights are (out_channels, in_channels)."""
    Cq = C // 8
    ks = jax.random.split(key, 6)
    scale = 1.0 / jnp.sqrt(jnp.float32(C))
    return {
        "wq": jax.random.uniform(ks[0], (Cq, C), jnp.float32, -scale, scale),
        "bq": jax.random.uniform(ks[1], (Cq,), jnp.float32, -scale, scale),
        "wk": jax.random.uniform(ks[2], (Cq, C), jnp.float32, -scale, scale),
        "bk": jax.random.uniform(ks[3], (Cq,), jnp.float32, -scale, scale),
        "wv": jax.random.uniform(ks[4], (C, C), jnp.float32, -scale, scale),
        "bv": jax.random.uniform(ks[5], (C,), jnp.float32, -scale, scale),
        "gamma": jnp.zeros((1,), jnp.float32),   # nn.Parameter(torch.zeros(1))
    }


def _reference(x_nchw, params):
    """Pure-JAX mirror of the PyTorch forward, f32 / highest precision."""
    hp = jax.lax.Precision.HIGHEST
    B, C, W, H = x_nchw.shape
    N = W * H
    x = x_nchw.reshape(B, C, N)
    q = jnp.einsum("oc,bcn->bon", params["wq"], x, precision=hp) + params["bq"][None, :, None]
    k = jnp.einsum("oc,bcn->bon", params["wk"], x, precision=hp) + params["bk"][None, :, None]
    v = jnp.einsum("oc,bcn->bon", params["wv"], x, precision=hp) + params["bv"][None, :, None]
    energy = jnp.einsum("bci,bcj->bij", q, k, precision=hp)          # (B, N, N)
    attn = jax.nn.softmax(energy, axis=-1)
    out = jnp.einsum("bcj,bij->bci", v, attn, precision=hp)          # (B, C, N)
    out = params["gamma"][0] * out.reshape(B, C, W, H) + x_nchw
    return out, attn


if __name__ == "__main__":
    key = jax.random.PRNGKey(0)
    kx, kp = jax.random.split(key)

    B, C, W, H = 2, 32, 16, 16          # N = 256 -> two 128-row query tiles; C//8 = 4
    x = jax.random.normal(kx, (B, C, W, H), jnp.float32)
    params = init_params(kp, C)
    # The module initializes gamma to 0 (out == x).  Use a nonzero gamma here so
    # the attention path actually contributes to the output check.
    params["gamma"] = jnp.full((1,), 0.5, jnp.float32)

    ref_out, ref_attn = _reference(x, params)

    # Exact path: f32 MXU inputs + exact reciprocal -> tight check.  (The bf16 +
    # approx-reciprocal fast path is opt-in for real-HW perf runs only.)
    out, attn = self_attn_forward(x, params, block_q=128,
                                  compute_dtype=jnp.float32, approx_recip=False)
    out = jax.block_until_ready(out)
    attn = jax.block_until_ready(attn)
    assert jnp.allclose(out, ref_out, atol=1e-5, rtol=1e-5)
    assert jnp.allclose(attn, ref_attn, atol=1e-5, rtol=1e-5)

    print("KERNEL_OK")
</pallas_src>

<mosaic_0001>
module attributes {stable_mosaic.version = 11 : i64} {
  func.func @self_attn_kernel(%arg0: i32, %arg1: i32, %arg2: memref<1x32x256xf32, #tpu.memory_space<vmem>>, %arg3: memref<8x32xf32, #tpu.memory_space<vmem>>, %arg4: memref<8x1xf32, #tpu.memory_space<vmem>>, %arg5: memref<8x32xf32, #tpu.memory_space<vmem>>, %arg6: memref<8x1xf32, #tpu.memory_space<vmem>>, %arg7: memref<32x32xf32, #tpu.memory_space<vmem>>, %arg8: memref<1x32xf32, #tpu.memory_space<vmem>>, %arg9: memref<1x1xf32, #tpu.memory_space<smem>>, %arg10: memref<1x32x128xf32, #tpu.memory_space<vmem>>, %arg11: memref<1x128x256xf32, #tpu.memory_space<vmem>>, %arg12: memref<8x256xf32, #tpu.memory_space<vmem>>, %arg13: memref<256x32xf32, #tpu.memory_space<vmem>>) attributes {dimension_semantics = [#tpu.dimension_semantics<parallel>, #tpu.dimension_semantics<arbitrary>], iteration_bounds = array<i64: 2, 2>, scalar_prefetch = 0 : i64, scratch_operands = 2 : i64, tpu.core_type = #tpu.core_type<tc>, window_params = [{transform_indices = @transform_0, window_bounds = array<i64: 1, 32, 256>}, {pipeline_mode = #tpu.pipeline_mode<synchronous>, transform_indices = @transform_1, window_bounds = array<i64: 8, 32>}, {pipeline_mode = #tpu.pipeline_mode<synchronous>, transform_indices = @transform_2, window_bounds = array<i64: 8, 1>}, {pipeline_mode = #tpu.pipeline_mode<synchronous>, transform_indices = @transform_3, window_bounds = array<i64: 8, 32>}, {pipeline_mode = #tpu.pipeline_mode<synchronous>, transform_indices = @transform_4, window_bounds = array<i64: 8, 1>}, {pipeline_mode = #tpu.pipeline_mode<synchronous>, transform_indices = @transform_5, window_bounds = array<i64: 32, 32>}, {pipeline_mode = #tpu.pipeline_mode<synchronous>, transform_indices = @transform_6, window_bounds = array<i64: 1, 32>}, {transform_indices = @transform_7, window_bounds = array<i64: 1, 1>}, {transform_indices = @transform_8, window_bounds = array<i64: 1, 32, 128>}, {transform_indices = @transform_9, window_bounds = array<i64: 1, 128, 256>}]} {
    %c0_i32 = arith.constant 0 : i32
    %0 = arith.cmpi eq, %arg1, %c0_i32 : i32
    %1 = arith.extui %0 : i1 to i32
    %c0_i32_0 = arith.constant 0 : i32
    %2 = arith.cmpi ne, %1, %c0_i32_0 : i32
    scf.if %2 {
      %c0_22 = arith.constant 0 : index
      %c0_23 = arith.constant 0 : index
      %c0_24 = arith.constant 0 : index
      %38 = vector.load %arg2[%c0_22, %c0_23, %c0_24] : memref<1x32x256xf32, #tpu.memory_space<vmem>>, vector<1x32x256xf32>
      %39 = vector.shape_cast %38 : vector<1x32x256xf32> to vector<32x256xf32>
      %c0_25 = arith.constant 0 : index
      %c0_26 = arith.constant 0 : index
      %40 = vector.load %arg5[%c0_25, %c0_26] : memref<8x32xf32, #tpu.memory_space<vmem>>, vector<8x32xf32>
      %cst_27 = arith.constant dense<0.000000e+00> : vector<8x256xf32>
      %41 = tpu.matmul %40, %39, %cst_27 {dimension_numbers = #tpu.dot_dimension_numbers<[1], [0], [0], [1], [0, 0, 1, 1], [], []>} : vector<8x32xf32>, vector<32x256xf32>, vector<8x256xf32> -> vector<8x256xf32>
      %c0_28 = arith.constant 0 : index
      %c0_29 = arith.constant 0 : index
      %42 = vector.load %arg6[%c0_28, %c0_29] : memref<8x1xf32, #tpu.memory_space<vmem>>, vector<8x1xf32>
      %43 = vector.broadcast %42 : vector<8x1xf32> to vector<8x256xf32>
      %44 = arith.addf %41, %43 : vector<8x256xf32>
      %c0_30 = arith.constant 0 : index
      %c0_31 = arith.constant 0 : index
      %45 = vector.load %arg12[%c0_30, %c0_31] : memref<8x256xf32, #tpu.memory_space<vmem>>, vector<8x256xf32>
      tpu.vector_store %arg12[%c0_30, %c0_31], %44 {strides = array<i32>} : memref<8x256xf32, #tpu.memory_space<vmem>>, vector<8x256xf32>,
      %c0_32 = arith.constant 0 : index
      %c0_33 = arith.constant 0 : index
      %46 = vector.load %arg7[%c0_32, %c0_33] : memref<32x32xf32, #tpu.memory_space<vmem>>, vector<32x32xf32>
      %cst_34 = arith.constant dense<0.000000e+00> : vector<256x32xf32>
      %47 = tpu.matmul %39, %46, %cst_34 {dimension_numbers = #tpu.dot_dimension_numbers<[0], [0], [1], [1], [0, 1, 1, 1], [], []>} : vector<32x256xf32>, vector<32x32xf32>, vector<256x32xf32> -> vector<256x32xf32>
      %c0_35 = arith.constant 0 : index
      %c0_36 = arith.constant 0 : index
      %48 = vector.load %arg8[%c0_35, %c0_36] : memref<1x32xf32, #tpu.memory_space<vmem>>, vector<1x32xf32>
      %49 = vector.broadcast %48 : vector<1x32xf32> to vector<256x32xf32>
      %50 = arith.addf %47, %49 : vector<256x32xf32>
      %c0_37 = arith.constant 0 : index
      %c0_38 = arith.constant 0 : index
      %51 = vector.load %arg13[%c0_37, %c0_38] : memref<256x32xf32, #tpu.memory_space<vmem>>, vector<256x32xf32>
      tpu.vector_store %arg13[%c0_37, %c0_38], %50 {strides = array<i32>} : memref<256x32xf32, #tpu.memory_space<vmem>>, vector<256x32xf32>,
    } else {
    }
    %c128_i32 = arith.constant 128 : i32
    %3 = arith.muli %arg1, %c128_i32 : i32
    %4 = tpu.assume_multiple %3, 128 : i32
    %c0 = arith.constant 0 : index
    %c0_1 = arith.constant 0 : index
    %5 = arith.index_cast %4 : i32 to index
    %6 = vector.load %arg2[%c0, %c0_1, %5] : memref<1x32x256xf32, #tpu.memory_space<vmem>>, vector<1x32x128xf32>
    %7 = vector.shape_cast %6 : vector<1x32x128xf32> to vector<32x128xf32>
    %c0_2 = arith.constant 0 : index
    %c0_3 = arith.constant 0 : index
    %8 = vector.load %arg3[%c0_2, %c0_3] : memref<8x32xf32, #tpu.memory_space<vmem>>, vector<8x32xf32>
    %cst = arith.constant dense<0.000000e+00> : vector<8x128xf32>
    %9 = tpu.matmul %8, %7, %cst {dimension_numbers = #tpu.dot_dimension_numbers<[1], [0], [0], [1], [0, 0, 1, 1], [], []>} : vector<8x32xf32>, vector<32x128xf32>, vector<8x128xf32> -> vector<8x128xf32>
    %c0_4 = arith.constant 0 : index
    %c0_5 = arith.constant 0 : index
    %10 = vector.load %arg4[%c0_4, %c0_5] : memref<8x1xf32, #tpu.memory_space<vmem>>, vector<8x1xf32>
    %11 = vector.broadcast %10 : vector<8x1xf32> to vector<8x128xf32>
    %12 = arith.addf %9, %11 : vector<8x128xf32>
    %c0_6 = arith.constant 0 : index
    %c0_7 = arith.constant 0 : index
    %13 = vector.load %arg12[%c0_6, %c0_7] : memref<8x256xf32, #tpu.memory_space<vmem>>, vector<8x256xf32>
    %cst_8 = arith.constant dense<0.000000e+00> : vector<128x256xf32>
    %14 = tpu.matmul %12, %13, %cst_8 {dimension_numbers = #tpu.dot_dimension_numbers<[0], [0], [1], [1], [0, 1, 1, 1], [], []>} : vector<8x128xf32>, vector<8x256xf32>, vector<128x256xf32> -> vector<128x256xf32>
    %cst_9 = arith.constant dense<0xFF800000> : vector<128xf32>
    %15 = vector.multi_reduction <maximumf>, %14, %cst_9 [1] : vector<128x256xf32> to vector<128xf32>
    %16 = vector.shape_cast %15 : vector<128xf32> to vector<128x1xf32>
    %17 = vector.broadcast %16 : vector<128x1xf32> to vector<128x256xf32>
    %18 = arith.subf %14, %17 : vector<128x256xf32>
    %19 = math.exp %18 : vector<128x256xf32>
    %cst_10 = arith.constant dense<0.000000e+00> : vector<128xf32>
    %20 = vector.multi_reduction <add>, %19, %cst_10 [1] : vector<128x256xf32> to vector<128xf32>
    %21 = vector.shape_cast %20 : vector<128xf32> to vector<128x1xf32>
    %22 = tpu.reciprocal %21 : vector<128x1xf32> -> vector<128x1xf32>
    %23 = vector.broadcast %22 : vector<128x1xf32> to vector<128x256xf32>
    %24 = arith.mulf %19, %23 : vector<128x256xf32>
    %c0_11 = arith.constant 0 : index
    %c0_12 = arith.constant 0 : index
    %c0_13 = arith.constant 0 : index
    %25 = vector.load %arg11[%c0_11, %c0_12, %c0_13] : memref<1x128x256xf32, #tpu.memory_space<vmem>>, vector<1x128x256xf32>
    %26 = vector.shape_cast %25 : vector<1x128x256xf32> to vector<128x256xf32>
    %27 = vector.shape_cast %24 : vector<128x256xf32> to vector<1x128x256xf32>
    tpu.vector_store %arg11[%c0_11, %c0_12, %c0_13], %27 {strides = array<i32>} : memref<1x128x256xf32, #tpu.memory_space<vmem>>, vector<1x128x256xf32>,
    %c0_14 = arith.constant 0 : index
    %c0_15 = arith.constant 0 : index
    %28 = vector.load %arg13[%c0_14, %c0_15] : memref<256x32xf32, #tpu.memory_space<vmem>>, vector<256x32xf32>
    %cst_16 = arith.constant dense<0.000000e+00> : vector<128x32xf32>
    %29 = tpu.matmul %24, %28, %cst_16 {dimension_numbers = #tpu.dot_dimension_numbers<[1], [0], [0], [1], [0, 0, 1, 1], [], []>} : vector<128x256xf32>, vector<256x32xf32>, vector<128x32xf32> -> vector<128x32xf32>
    %c0_17 = arith.constant 0 : index
    %c0_18 = arith.constant 0 : index
    %30 = memref.load %arg9[%c0_17, %c0_18] : memref<1x1xf32, #tpu.memory_space<smem>>
    %31 = tpu.transpose %29, [1, 0] : vector<128x32xf32> -> vector<32x128xf32>
    %32 = vector.broadcast %30 : f32 to vector<32x128xf32>
    %33 = arith.mulf %32, %31 : vector<32x128xf32>
    %34 = arith.addf %33, %7 : vector<32x128xf32>
    %c0_19 = arith.constant 0 : index
    %c0_20 = arith.constant 0 : index
    %c0_21 = arith.constant 0 : index
    %35 = vector.load %arg10[%c0_19, %c0_20, %c0_21] : memref<1x32x128xf32, #tpu.memory_space<vmem>>, vector<1x32x128xf32>
    %36 = vector.shape_cast %35 : vector<1x32x128xf32> to vector<32x128xf32>
    %37 = vector.shape_cast %34 : vector<32x128xf32> to vector<1x32x128xf32>
    tpu.vector_store %arg10[%c0_19, %c0_20, %c0_21], %37 {strides = array<i32>} : memref<1x32x128xf32, #tpu.memory_space<vmem>>, vector<1x32x128xf32>,
    return
  }
  func.func @transform_0(%arg0: i32, %arg1: i32) -> (i32, i32, i32) {
    %c0_i32 = arith.constant 0 : i32
    %c0_i32_0 = arith.constant 0 : i32
    %c0_i32_1 = arith.constant 0 : i32
    return %arg0, %c0_i32, %c0_i32_0 : i32, i32, i32
  }
  func.func @transform_1(%arg0: i32, %arg1: i32) -> (i32, i32) {
    %c0_i32 = arith.constant 0 : i32
    %c0_i32_0 = arith.constant 0 : i32
    %c0_i32_1 = arith.constant 0 : i32
    return %c0_i32, %c0_i32_0 : i32, i32
  }
  func.func @transform_2(%arg0: i32, %arg1: i32) -> (i32, i32) {
    %c0_i32 = arith.constant 0 : i32
    %c0_i32_0 = arith.constant 0 : i32
    %c0_i32_1 = arith.constant 0 : i32
    return %c0_i32, %c0_i32_0 : i32, i32
  }
  func.func @transform_3(%arg0: i32, %arg1: i32) -> (i32, i32) {
    %c0_i32 = arith.constant 0 : i32
    %c0_i32_0 = arith.constant 0 : i32
    %c0_i32_1 = arith.constant 0 : i32
    return %c0_i32, %c0_i32_0 : i32, i32
  }
  func.func @transform_4(%arg0: i32, %arg1: i32) -> (i32, i32) {
    %c0_i32 = arith.constant 0 : i32
    %c0_i32_0 = arith.constant 0 : i32
    %c0_i32_1 = arith.constant 0 : i32
    return %c0_i32, %c0_i32_0 : i32, i32
  }
  func.func @transform_5(%arg0: i32, %arg1: i32) -> (i32, i32) {
    %c0_i32 = arith.constant 0 : i32
    %c0_i32_0 = arith.constant 0 : i32
    %c0_i32_1 = arith.constant 0 : i32
    return %c0_i32, %c0_i32_0 : i32, i32
  }
  func.func @transform_6(%arg0: i32, %arg1: i32) -> (i32, i32) {
    %c0_i32 = arith.constant 0 : i32
    %c0_i32_0 = arith.constant 0 : i32
    %c0_i32_1 = arith.constant 0 : i32
    return %c0_i32, %c0_i32_0 : i32, i32
  }
  func.func @transform_7(%arg0: i32, %arg1: i32) -> (i32, i32) {
    %c0_i32 = arith.constant 0 : i32
    %c0_i32_0 = arith.constant 0 : i32
    %c0_i32_1 = arith.constant 0 : i32
    return %c0_i32, %c0_i32_0 : i32, i32
  }
  func.func @transform_8(%arg0: i32, %arg1: i32) -> (i32, i32, i32) {
    %c0_i32 = arith.constant 0 : i32
    %c0_i32_0 = arith.constant 0 : i32
    return %arg0, %c0_i32, %arg1 : i32, i32, i32
  }
  func.func @transform_9(%arg0: i32, %arg1: i32) -> (i32, i32, i32) {
    %c0_i32 = arith.constant 0 : i32
    %c0_i32_0 = arith.constant 0 : i32
    return %arg0, %arg1, %c0_i32 : i32, i32, i32
  }
}

</mosaic_0001>

<bundles_post_ra>
// kernel: tpu_custom_call.1
= control target key start
LH: loop header
LB: loop body
LE: loop exit
PB: predicated region body
PF: predicated region fallthrough
CT: control target
= control target key end

     0   :  { %s3557_s0 = inlined_call_operand.hbm [shape: f32[2,32,256], index: 0, kind: input, shape index: {}]   ;;  %s3558_s1 = inlined_call_operand.vmem [shape: f32[8,32], index: 1, kind: input, shape index: {}]   ;;  %s3559_s2 = inlined_call_operand.vmem [shape: f32[8,1], index: 2, kind: input, shape index: {}]   ;;  %s3560_s3 = inlined_call_operand.hbm [shape: f32[8,32], index: 3, kind: input, shape index: {}]   ;;  %s3561_s4 = inlined_call_operand.vmem [shape: f32[8,1], index: 4, kind: input, shape index: {}]   ;;  %s3562_s5 = inlined_call_operand.vmem [shape: f32[32,32], index: 5, kind: input, shape index: {}]   ;;  %s3563_s6 = inlined_call_operand.vmem [shape: f32[1,32], index: 6, kind: input, shape index: {}]   ;;  %s3564_s7 = inlined_call_operand.<no memory space> [shape: f32[1,1], index: 7, kind: input, shape index: {}]   ;;  %s3565_s8 = inlined_call_operand.hbm [shape: f32[2,32,256], index: 8, kind: output, shape index: {0}]   ;;  %s3566_s9 = inlined_call_operand.hbm [shape: f32[2,256,256], index: 9, kind: output, shape index: {1}]  }
   0x1   :  { %3584 = sst [smem:[#allocation24_spill]] %s3557_s0 }
   0x2   :  { %3585 = sst [smem:[#allocation25_spill]] %s3560_s3 }
   0x3   :  { %3586 = sst [smem:[#allocation26_spill]] %s3565_s8 }
   0x4   :  { %3587 = sst [smem:[#allocation27_spill]] %s3566_s9 }
   0x5   :  { %15 = sst [smem:[#allocation4]] %s3564_s7 }
   0x6   :  { %16 = vsyncpa [#allocation6], 0 }
   0x7   :  { %18 = vsyncpa [#allocation6 + $0x1], 0 }
   0x8   :  { %19 = vsyncpa [#allocation9], 0 }
   0x9   :  { %20 = vsyncpa [#allocation7], 0 }
   0xa   :  { %22 = vsyncpa [#allocation7 + $0x1], 0 }
   0xb   :  { %23 = vsyncpa [#allocation12], 0 }
   0xc   :  { %25 = vsyncpa [#allocation12 + $0x1], 0  ;;  %s2778_s11 = smov 0   ;;  %s2780_s12 = smov 0  }
   0xd   :  { %s2782_s13 = smov 0   ;;  %s2784_s14 = smov 0  }
   0xe   :  { %s2786_s15 = smov 0   ;;  %s2788_s16 = smov 0  }
   0xf   :  { %s2790_s7 = smov 0   ;;  %s2792_s17 = smov 0  }
  0x10   :  { %s2794_s18 = smov 0   ;;  %s2796_s19 = smov 0  }
  0x11   :  { %s2798_s20 = smov 0  }
  0x12 LB: > { %3588 = sst [smem:[#allocation17_spill]] %s2667_s11  ;;  %s1918_s21 = sadd.s32 4294967295, %s2707_s20   ;;  %s2707_s20 = sphi %s2798_s20, %s3630_s20   ;;  %s2703_s19 = sphi %s2796_s19, %s3629_s19   ;;  %s2699_s18 = sphi %s2794_s18, %s3628_s18   ;;  %s2695_s17 = sphi %s2792_s17, %s3627_s17   ;;  %s2691_s7 = sphi %s2790_s7, %s3619_s7   ;;  %s2687_s16 = sphi %s2788_s16, %s3626_s16   ;;  %s2683_s15 = sphi %s2786_s15, %s3625_s15   ;;  %s2679_s14 = sphi %s2784_s14, %s3624_s14   ;;  %s2675_s13 = sphi %s2782_s13, %s3623_s13   ;;  %s2671_s12 = sphi %s2780_s12, %s3622_s12   ;;  %s2667_s11 = sphi %s2778_s11, %s3621_s11  }
  0x13   : > { %3589 = sst [smem:[#allocation18_spill]] %s2695_s17  ;;  %s1919_s22 = sadd.s32 4294967294, %s2707_s20  }
  0x14   : > { %3590 = sst [smem:[#allocation19_spill]] %s2699_s18  ;;  %p57_p0 = scmp.ne.s32.totalorder %s2687_s16, %s2683_s15 }
  0x15   : > { %3591 = sst [smem:[#allocation20_spill]] %s2707_s20  ;;  %p58_p1 = scmp.eq.s32.totalorder %s2707_s20, 0 }
  0x16   : > { %p63_p2 = scmp.ne.s32.totalorder %s2683_s15, %s2679_s14  ;;  %p2838_p3 = scmp.eq.s32.totalorder %s1918_s21, 0 }
  0x17   : > { %p2842_p4 = por %p58_p1, %p57_p0  ;;  %p235_p5 = scmp.ne.s32.totalorder %s2675_s13, %s2671_s12 }
  0x18   : > { %s3592_s24 = scalar_select %p2838_p3, 1, 0 }
  0x19   : > { %p2850_p6 = por %p2838_p3, %p63_p2  ;;  %p236_p7 = scmp.eq.s32.totalorder %s1918_s21, 3 }
  0x1a   : > { %p241_p8 = scmp.ne.s32.totalorder %s2671_s12, %s2667_s11  ;;  %p242_p9 = scmp.eq.s32.totalorder %s1919_s22, 3 }
  0x1b   : > { %s3594_s26 = scalar_select %p2850_p6, 1, 0 }
  0x1c   : > { %p2856_p10 = por %p236_p7, %p235_p5  ;;  %p1920_p11 = scmp.ge.s32.totalorder %s2707_s20, 1 }
  0x1d   : > { %p2861_p12 = por %p242_p9, %p241_p8  ;;  %p277_p13 = scmp.lt.s32.totalorder %s2707_s20, 5 }
  0x1e   : > { %s3595_s27 = scalar_select %p2856_p10, 1, 0 }
  0x1f   : > { %s3597_s28 = scalar_select %p2861_p12, 1, 0 }
  0x20   : > { %3596 = sst [smem:[#allocation21_spill]] %s3595_s27  ;;  %p2866_p0 = pnand %p1920_p11, %p277_p13 }
  0x21   : > { %3598 = sst [smem:[#allocation22_spill]] %s3597_s28  ;;  %s2709_s30 = smov [#allocation8]  }
  0x22   : > { %s3599_s29 = scalar_select %p2866_p0, 1, 0 }
  0x23   : > { %s296_s10 = sshll.u32 %s2709_s30, 4  ;;  %p2269_p1 = pneg %p2866_p0  ;;  %s297_s10 = int_to_ptr.vmem [resolvable:$true] %s296_s10 }
  0x24   : > { %p2285_p2 = scmp.lt.s32.totalorder %s2707_s20, 4  ;;  %s3602_s3 = sld [smem:[#allocation25_spill]] }
  0x25   : > { %p2875_p5 = pnand %p2269_p1, %p2838_p3 }
  0x26   : > { %p2881_p7 = pnand %p2285_p2, %p2842_p4 }
  0x27   : > { %p2493_p9 = pneg %p2875_p5 }
  0x28   : > { %s3601_s21 = scalar_select %p2881_p7, 1, 0 }
  0x2a   : > { %s2491_s28 = scalar_lea.hbm %s3602_s3, 128 }
  0x2b   : > { %p2492_p8 = scmp.ne.s32.totalorder %s3602_s3, %s2491_s28  ;;  %p2498_p1 = scmp.lt.u32.totalorder %s2491_s28, %s3602_s3 }
  0x2d   : > { %p2494_p11 = pnand %p2493_p9, %p2492_p8 }
  0x2f   : > { %p2495_p13 = pneg %p2494_p11 }
  0x31   : > { %p2500_p4 = pnand %p2498_p1, %p2495_p13 }
  0x33   : > { %2503 = shalt.err (!%p2500_p4)
}
  0x34   : > { %s2504_s25 = scalar_lea.vmem %s297_s10, 128  ;;  %p2512_p3 = scmp.lt.s32.totalorder %s297_s10, %s297_s10 }
  0x35   : > { %p2505_p2 = scmp.ne.s32.totalorder %s297_s10, %s2504_s25  ;;  %p2513_p6 = scmp.lt.s32.totalorder %s2504_s25, %s2504_s25 }
  0x37   : > { %p2507_p12 = pnand %p2505_p2, %p2493_p9  ;;  %p2514_p0 = por %p2513_p6, %p2512_p3 }
  0x39   : > { %p2508_p10 = pneg %p2507_p12 }
  0x3b   : > { %p2515_p7 = pnand %p2514_p0, %p2508_p10 }
  0x3d   : > { %2518 = shalt.err (!%p2515_p7)
}
  0x3e   : > { %2272 = dma.hbm_to_vmem [thread:$0]  (!%p2875_p5), %s3602_s3, 128, %s297_s10, [#allocation9]  }
  0x3f   : > { %s40_s8 = sadd.s32 1, %s2699_s18  ;;  %s43_s20 = sadd.s32 1, %s2703_s19 }
  0x40   : > { %p41_p12 = scmp.ge.s32.totalorder %s40_s8, 2  ;;  %s319_s28 = sand.u32 1, %s2687_s16  }
  0x41   : > { %s225_s22 = sadd.s32 1, %s2675_s13  ;;  %s1923_s14 = sshll.u32 %s319_s28, 6 }
  0x42   : > { %s3632_s8 = smov (%p41_p12, %s40_s8), 0  ;;  %s3634_s20 = smov (!%p41_p12, %s43_s20), %s2703_s19 }
  0x43   : > { %3603 = sst [smem:[#allocation23_spill]] %s3632_s8  ;;  %p45_p3 = scmp.ge.s32.totalorder %s3634_s20, 2 }
  0x44   : > { %s1995_s30 = sshll.u32 %s2703_s19, 10  ;;  %s221_s25 = ssub.s32 %s2699_s18, %s3632_s8 }
  0x45   : > { %s323_s10 = scalar_lea.vmem [#allocation5], %s1923_s14  ;;  %s3636_s20 = smov (%p45_p3, %s3634_s20), 0 }
  0x46   : > { %s330_s11 = sshll.u32 %s323_s10, 4  ;;  %s3604_s0 = sld [smem:[#allocation24_spill]]  ;;  %s2918_s11 = int_to_ptr.vmem [resolvable:$true] %s330_s11 }
  0x47   : > { %s47_s27 = ssub.s32 %s2703_s19, %s3636_s20  ;;  %s3605_s14 = sadd.s32 1, %s2687_s16 }
  0x48   : > { %p48_p6 = scmp.eq.s32.totalorder %s47_s27, 0  ;;  %s222_s8 = sor.u32 %s221_s25, %s47_s27 }
  0x49   : > { %p223_p10 = scmp.eq.s32.totalorder %s222_s8, 0  ;;  %s2930_s17 = scalar_lea.sflag [#allocation6], %s319_s28 }
  0x4a   : > { %s2925_s10 = scalar_select %p48_p6, %s2687_s16, %s3605_s14  }
  0x4b   : > { %s2928_s18 = scalar_select %p223_p10, %s2675_s13, %s225_s22  }
  0x4c   : > { %s2916_s9 = scalar_lea.hbm %s3604_s0, %s1995_s30  ;;  %p3606_p5 = scmp.ne.s32.totalorder %s3601_s21, 0 }
  0x4d   : > { %s2519_s3 = scalar_lea.hbm %s2916_s9, 1024  ;;  %s2524_s27 = scalar_lea.hbm %s3604_s0, 2048 }
  0x4e   : > { %p2520_p0 = scmp.ne.s32.totalorder %s2916_s9, %s2519_s3  ;;  %p2521_p7 = pneg %p3606_p5 }
  0x4f   : > { %p2525_p11 = scmp.lt.u32.totalorder %s2916_s9, %s3604_s0  ;;  %p2526_p13 = scmp.lt.u32.totalorder %s2524_s27, %s2519_s3 }
  0x50   : > { %p2522_p8 = pnand %p2521_p7, %p2520_p0  ;;  %p2528_p4 = scmp.lt.u32.totalorder %s2519_s3, %s2916_s9 }
  0x51   : > { %p2527_p1 = por %p2526_p13, %p2525_p11 }
  0x52   : > { %p2523_p9 = pneg %p2522_p8 }
  0x53   : > { %p2529_p2 = por %p2528_p4, %p2527_p1 }
  0x55   : > { %p2530_p12 = pnand %p2529_p2, %p2523_p9 }
  0x57   : > { %2533 = shalt.err (!%p2530_p12)
}
  0x58   : > { %s2534_s28 = scalar_lea.vmem %s2918_s11, 1024  ;;  %s2710_s22 = smov [#allocation5]  }
  0x59   : > { %p2535_p3 = scmp.ne.s32.totalorder %s2918_s11, %s2534_s28  ;;  %s2539_s14 = sshll.u32 %s2710_s22, 4  ;;  %s2540_s14 = int_to_ptr.vmem [resolvable:$false] %s2539_s14 }
  0x5a   : > { %s2541_s30 = scalar_lea.vmem %s2540_s14, 2048  ;;  %p2542_p0 = scmp.lt.s32.totalorder %s2918_s11, %s2540_s14 }
  0x5b   : > { %p2537_p6 = pnand %p2535_p3, %p2521_p7  ;;  %p2543_p8 = scmp.lt.s32.totalorder %s2541_s30, %s2534_s28 }
  0x5d   : > { %p2538_p10 = pneg %p2537_p6  ;;  %p2544_p11 = por %p2543_p8, %p2542_p0 }
  0x5f   : > { %p2545_p13 = pnand %p2544_p11, %p2538_p10 }
  0x61   : > { %2548 = shalt.err (!%p2545_p13)
}
  0x62   : > { %s2711_s3 = smov 256   ;;  %s2712_s23 = smov 16  }
  0x63   : > { %2276 = dma.hbm_to_vmem [thread:$0]  (!%p3606_p5), %s2916_s9, 1024, %s2918_s11, %s2930_s17, %s2711_s3, %s2711_s3, %s2712_s23  }
  0x64   : > { %p3607_p7 = scmp.ne.s32.totalorder %s3599_s29, 0 }
  0x65   : > { %s344_s27 = sand.u32 (!%p3607_p7), 1, %s2683_s15   ;;  %p3608_p9 = scmp.ne.s32.totalorder (!%p3607_p7), %s3594_s26, 0 }
  0x66   : > { %342 = sbr.rel (%p3607_p7) target bundleno = 1827 (0x723), region = 52  ;;  %s1927_s8 = sshll.u32 (!%p3607_p7), %s344_s27, 6 }
  0x67   : > { %s345_s25 = scalar_lea.sflag (!%p3607_p7), [#allocation6], %s344_s27  ;;  %s2961_s28 = scalar_lea.vmem (!%p3607_p7), [#allocation5], %s1927_s8 }
  0x6d   : > { %2650 = dma.done.wait (%p3608_p9), %s345_s25, 1024  }
  0x6e   : > { %2652 = vsyncadd (%p3608_p9), %s345_s25, 4294966272  ;;  %p3609_p1 = scmp.ne.s32.totalorder %s3592_s24, 0 }
  0x70   : > { %2654 = dma.done.wait (%p3609_p1), [#allocation9], 128  }
  0x71   : > { %2656 = vsyncadd (%p3609_p1), [#allocation9], 4294967168  ;;  %s2972_s9 = sand.u32 1, %s2671_s12   ;;  %p1931_p5 = scmp.ne.s32.totalorder %s2691_s7, 0 }
  0x72   : > { %s1929_s17 = sshll.u32 %s2972_s9, 5  ;;  %s1930_s29 = sshll.u32 %s2972_s9, 8  ;;  %v397_v0 = vld [vmem:[%s2961_s28] sm:$0xff] (!%p1931_p5)  ;;  %v399_v1 = vld [vmem:[%s2961_s28 + $0x10] sm:$0xff] (!%p1931_p5)  ;;  %v398_v2 = vld [vmem:[%s2961_s28 + $0x8] sm:$0xff] (!%p1931_p5)  ;;  %v2713_v5 = vmov (!%p1931_p5), 0.0  }
  0x73   : > { %s2976_s21 = scalar_lea.vmem [#allocation10], %s1929_s17  ;;  %s2978_s11 = scalar_lea.vmem [#allocation11], %s1930_s29  ;;  %500 = vxpose.xlu0.b32.start [1/4] (short) (!%p1931_p5), %v397_v0, 128  ;;  %v400_v3 = vld [vmem:[%s2961_s28 + $0x18] sm:$0xff] (!%p1931_p5)  ;;  %v2187_v4 = vpack.c.bf16 (!%p1931_p5), %v399_v1, %v397_v0  ;;  %480 = vmatprep.mubr.f32.mxu0 (!%p1931_p5), %v2713_v5  ;;  %v402_v6 = vld [vmem:[%s2961_s28 + $0x28] sm:$0xff] (!%p1931_p5)  ;;  %v489_v9 = vld [vmem:[%s3562_s5] sm:$0xff] (!%p1931_p5)  ;;  %vm412_vm0 = vcmask (!%p1931_p5), 261120  }
  0x74   : > { %396 = sbr.rel (%p1931_p5) target bundleno = 552 (0x228), region = 64  ;;  %532 = vxpose.xlu1.b32.start [1/4] (short) (!%p1931_p5), %v398_v2, 128  ;;  %v404_v7 = vld [vmem:[%s2961_s28 + $0x38] sm:$0xff] (!%p1931_p5)  ;;  %v2185_v8 = vpack.c.bf16 (!%p1931_p5), %v400_v3, %v398_v2  ;;  %v401_v12 = vld [vmem:[%s2961_s28 + $0x20] sm:$0xff] (!%p1931_p5)  ;;  %v403_v13 = vld [vmem:[%s2961_s28 + $0x30] sm:$0xff] (!%p1931_p5)  ;;  %v2714_v20 = vmov (!%p1931_p5), 0  }
  0x75   : > { %v2189_v10 = vpack.c.bf16 (!%p1931_p5), %v404_v7, %v402_v6  ;;  %v490_v11 = vld [vmem:[%s3562_s5 + $0x8] sm:$0xff] (!%p1931_p5)  ;;  %v2191_v14 = vpack.c.bf16 (!%p1931_p5), %v403_v13, %v401_v12  ;;  %v491_v16 = vld [vmem:[%s3562_s5 + $0x10] sm:$0xff] (!%p1931_p5)  ;;  %v492_v17 = vld [vmem:[%s3562_s5 + $0x18] sm:$0xff] (!%p1931_p5) }
  0x76   : > { %2186 = vmatprep.subr.bf16.mxu0 (!%p1931_p5), %v2185_v8  ;;  %v2193_v15 = vpack.c.bf16 (!%p1931_p5), %v490_v11, %v489_v9  ;;  %v405_v18 = vld [vmem:[#allocation8] sm:$0xff] (!%p1931_p5)  ;;  %v2197_v19 = vpack.c.bf16 (!%p1931_p5), %v492_v17, %v491_v16  ;;  %v406_v21 = vld [vmem:[%s3561_s4] sm:$0xff] (!%p1931_p5) }
  0x77   : > { %501 = vxpose.xlu0.b32.cont [2/4] (short) (!%p1931_p5), %v399_v1, 128  ;;  %2188 = vmatpush1.bf16.msra.mxu0 (!%p1931_p5), %v2187_v4  ;;  %v3040_v59 = vld [vmem:[%s3563_s6] ss:$0 sm:$0xff] (!%p1931_p5) }
  0x78   : > { %533 = vxpose.xlu1.b32.cont [2/4] (short) (!%p1931_p5), %v400_v3, 128  ;;  %2190 = vmatprep.subr.bf16.mxu0 (!%p1931_p5), %v2189_v10 }
  0x79   : > { %2239 = vmatprep.subr.bf16.mxu1 (!%p1931_p5), %v2193_v15 }
  0x7a   : > { %2241 = vmatpush3.bf16.msra.mxu1 (!%p1931_p5), %v2193_v15 }
  0x7b   : > { %502 = vxpose.xlu0.b32.cont [3/4] (short) %v401_v12, 128  ;;  %2192 = vmatpush1.bf16.msra.mxu0 %v2191_v14 }
  0x7c   : > { %534 = vxpose.xlu1.b32.cont [3/4] (short) %v402_v6, 128  ;;  %2194 = vmatprep.subr.bf16.mxu0 %v2193_v15 }
  0x7d   : > { %2240 = vmatprep.subr.bf16.mxu1 %v2197_v19 }
  0x7e   : > { %1932 = vmatmul.mubr.msk.f32.vlgmr.msra.gmra.mrb[0].mxu0 %vm412_vm0, %v405_v18  ;;  %2242 = vmatpush3.bf16.msra.mxu1 %v2197_v19 }
  0x7f   : > { %503 = vxpose.xlu0.b32.end [4/4] (short) %v403_v13, 128  ;;  %2196 = vmatpush3.bf16.msra.mxu0 %v2193_v15 }
  0x80   : > { %535 = vxpose.xlu1.b32.end [4/4] (short) %v404_v7, 128  ;;  %2198 = vmatprep.subr.bf16.mxu0 %v2197_v19 }
  0x83   : > { %2200 = vmatpush3.bf16.msra.mxu0 %v2197_v19 }
  0xa8   : > { %2389 = vset.pattern.permute.xlu0 %v2714_v20 }
  0xd8   : > { %409 = vperm.xlu0 %2389, %v406_v21  }
  0xf3   : > { %v516_v22 = vpop.trf.xlu0 }
  0xf4   : > { %2126 = vmatprep.mubr.msk.f32.mxu0 %vm412_vm0, %v516_v22  ;;  %v548_v23 = vpop.trf.xlu1 }
  0xf7   : > { %v517_v24 = vpop.trf.xlu0 }
  0xf8   : > { %2127 = vmatmul.mubr.msk.f32.vlgmr.msra.gmra.mrb[2].mxu0 %vm412_vm0, %v517_v24  ;;  %v549_v25 = vpop.trf.xlu1 }
  0xfb   : > { %v518_v26 = vpop.trf.xlu0 }
  0xfc   : > { %2129 = vmatprep.mubr.msk.f32.mxu0 %vm412_vm0, %v518_v26  ;;  %v550_v28 = vpop.trf.xlu1 }
  0xff   : > { %v519_v27 = vpop.trf.xlu0 }
 0x100   : > { %2130 = vmatmul.mubr.msk.f32.gmra.mrb[4].mxu0 %vm412_vm0, %v519_v27  ;;  %v551_v30 = vpop.trf.xlu1 }
 0x103   : > { %v520_v29 = vpop.trf.xlu0 }
 0x104   : > { %2132 = vmatprep.mubr.msk.f32.mxu0 %vm412_vm0, %v520_v29  ;;  %v552_v33 = vpop.trf.xlu1 }
 0x107   : > { %v521_v31 = vpop.trf.xlu0 }
 0x108   : > { %2133 = vmatmul.mubr.msk.f32.gmra.mrb[6].mxu0 %vm412_vm0, %v521_v31  ;;  %v553_v35 = vpop.trf.xlu1 }
 0x10b   : > { %v522_v32 = vpop.trf.xlu0 }
 0x10c   : > { %2135 = vmatprep.mubr.msk.f32.mxu0 %vm412_vm0, %v522_v32  ;;  %v554_v38 = vpop.trf.xlu1 }
 0x10f   : > { %v523_v34 = vpop.trf.xlu0 }
 0x110   : > { %2136 = vmatmul.mubr.msk.f32.gmra.mrb[8].mxu0 %vm412_vm0, %v523_v34  ;;  %v555_v40 = vpop.trf.xlu1 }
 0x113   : > { %v524_v36 = vpop.trf.xlu0 }
 0x114   : > { %2138 = vmatprep.mubr.msk.f32.mxu0 %vm412_vm0, %v524_v36  ;;  %v556_v43 = vpop.trf.xlu1 }
 0x117   : > { %v525_v37 = vpop.trf.xlu0 }
 0x118   : > { %2139 = vmatmul.mubr.msk.f32.gmra.mrb[10].mxu0 %vm412_vm0, %v525_v37  ;;  %v557_v45 = vpop.trf.xlu1 }
 0x11b   : > { %v526_v39 = vpop.trf.xlu0 }
 0x11c   : > { %2141 = vmatprep.mubr.msk.f32.mxu0 %vm412_vm0, %v526_v39  ;;  %v558_v48 = vpop.trf.xlu1 }
 0x11f   : > { %v527_v41 = vpop.trf.xlu0 }
 0x120   : > { %2142 = vmatmul.mubr.msk.f32.gmra.mrb[12].mxu0 %vm412_vm0, %v527_v41  ;;  %v559_v49 = vpop.trf.xlu1 }
 0x123   : > { %v528_v42 = vpop.trf.xlu0 }
 0x124   : > { %2144 = vmatprep.mubr.msk.f32.mxu0 %vm412_vm0, %v528_v42  ;;  %v560_v50 = vpop.trf.xlu1 }
 0x127   : > { %v529_v44 = vpop.trf.xlu0 }
 0x128   : > { %2145 = vmatmul.mubr.msk.f32.gmra.mrb[14].mxu0 %vm412_vm0, %v529_v44  ;;  %v561_v51 = vpop.trf.xlu1 }
 0x12b   : > { %v530_v46 = vpop.trf.xlu0 }
 0x12c   : > { %2147 = vmatprep.mubr.msk.f32.mxu1 %vm412_vm0, %v530_v46  ;;  %v562_v52 = vpop.trf.xlu1 }
 0x12f   : > { %v531_v47 = vpop.trf.xlu0 }
 0x130   : > { %2148 = vmatmul.mubr.msk.f32.vlgmr.msra.gmra.mrb[0].mxu1 %vm412_vm0, %v531_v47  ;;  %v563_v53 = vpop.trf.xlu1 }
 0x131   : > { %2150 = vmatprep.mubr.msk.f32.mxu1 %vm412_vm0, %v548_v23 }
 0x134   : > { %2151 = vmatmul.mubr.msk.f32.gmra.mrb[2].mxu1 %vm412_vm0, %v549_v25 }
 0x135   : > { %2153 = vmatprep.mubr.msk.f32.mxu1 %vm412_vm0, %v550_v28 }
 0x138   : > { %2154 = vmatmul.mubr.msk.f32.gmra.mrb[4].mxu1 %vm412_vm0, %v551_v30 }
 0x139   : > { %2156 = vmatprep.mubr.msk.f32.mxu1 %vm412_vm0, %v552_v33 }
 0x13c   : > { %2157 = vmatmul.mubr.msk.f32.gmra.mrb[6].mxu1 %vm412_vm0, %v553_v35 }
 0x13d   : > { %2159 = vmatprep.mubr.msk.f32.mxu1 %vm412_vm0, %v554_v38 }
 0x140   : > { %2160 = vmatmul.mubr.msk.f32.gmra.mrb[8].mxu1 %vm412_vm0, %v555_v40 }
 0x141   : > { %2162 = vmatprep.mubr.msk.f32.mxu1 %vm412_vm0, %v556_v43 }
 0x144   : > { %2163 = vmatmul.mubr.msk.f32.gmra.mrb[10].mxu1 %vm412_vm0, %v557_v45 }
 0x145   : > { %2165 = vmatprep.mubr.msk.f32.mxu1 %vm412_vm0, %v558_v48 }
 0x148   : > { %2166 = vmatmul.mubr.msk.f32.gmra.mrb[12].mxu1 %vm412_vm0, %v559_v49 }
 0x149   : > { %2168 = vmatprep.mubr.msk.f32.mxu1 %vm412_vm0, %v560_v50 }
 0x14c   : > { %2169 = vmatmul.mubr.msk.f32.gmra.mrb[14].mxu1 %vm412_vm0, %v561_v51 }
 0x14d   : > { %2171 = vmatprep.mubr.msk.f32.mxu1 %vm412_vm0, %v562_v52 }
 0x150   : > { %2172 = vmatmul.mubr.msk.f32.gmra.mrb[16].mxu1 %vm412_vm0, %v563_v53 }
 0x151   : > { %v482_v54 = vpop.f32.mrb[0].mxu0 }
 0x152   : > { %v484_v55 = vpop.f32.mrb[1].mxu0 }
 0x157   : > { %v410_v56 = vpop.permute.xlu0 %409 }
 0x158   : > { %v483_v57 = vadd.f32 %v482_v54, %v410_v56  ;;  %v485_v58 = vadd.f32 %v484_v55, %v410_v56 }
 0x15a   : > { %487 = vst [vmem:[#allocation2] sm:$0xff] %v483_v57  ;;  %488 = vst [vmem:[#allocation2 + $0x8] sm:$0xff] %v485_v58 }
 0x1cb   : > { %v2128_v60 = vpop.f32.mrb[2].mxu0 }
 0x1cc   : > { %v732_v61 = vadd.f32 %v2128_v60, %v3040_v59  ;;  %v726_v62 = vpop.f32.mrb[3].mxu0 }
 0x1cd   : > { %v727_v63 = vadd.f32 %v3040_v59, %v726_v62 }
 0x1ce   : > { %886 = vst.msk [vmem:[#allocation3 + $0x8] sm:$0xff] %vm412_vm0, %v732_v61 }
 0x1cf   : > { %885 = vst.msk [vmem:[#allocation3] sm:$0xff] %vm412_vm0, %v727_v63 }
 0x1d3   : > { %v2131_v0 = vpop.f32.mrb[4].mxu0 }
 0x1d4   : > { %v742_v1 = vadd.f32 %v2131_v0, %v3040_v59  ;;  %v736_v2 = vpop.f32.mrb[5].mxu0 }
 0x1d5   : > { %v737_v3 = vadd.f32 %v3040_v59, %v736_v2 }
 0x1d6   : > { %888 = vst.msk [vmem:[#allocation3 + $0x18] sm:$0xff] %vm412_vm0, %v742_v1 }
 0x1d7   : > { %887 = vst.msk [vmem:[#allocation3 + $0x10] sm:$0xff] %vm412_vm0, %v737_v3 }
 0x1db   : > { %v2134_v4 = vpop.f32.mrb[6].mxu0 }
 0x1dc   : > { %v752_v5 = vadd.f32 %v2134_v4, %v3040_v59  ;;  %v746_v6 = vpop.f32.mrb[7].mxu0 }
 0x1dd   : > { %v747_v7 = vadd.f32 %v3040_v59, %v746_v6 }
 0x1de   : > { %890 = vst.msk [vmem:[#allocation3 + $0x28] sm:$0xff] %vm412_vm0, %v752_v5 }
 0x1df   : > { %889 = vst.msk [vmem:[#allocation3 + $0x20] sm:$0xff] %vm412_vm0, %v747_v7 }
 0x1e3   : > { %v2137_v8 = vpop.f32.mrb[8].mxu0 }
 0x1e4   : > { %v762_v9 = vadd.f32 %v2137_v8, %v3040_v59  ;;  %v756_v10 = vpop.f32.mrb[9].mxu0 }
 0x1e5   : > { %v757_v11 = vadd.f32 %v3040_v59, %v756_v10 }
 0x1e6   : > { %892 = vst.msk [vmem:[#allocation3 + $0x38] sm:$0xff] %vm412_vm0, %v762_v9 }
 0x1e7   : > { %891 = vst.msk [vmem:[#allocation3 + $0x30] sm:$0xff] %vm412_vm0, %v757_v11 }
 0x1eb   : > { %v2140_v12 = vpop.f32.mrb[10].mxu0 }
 0x1ec   : > { %v772_v13 = vadd.f32 %v2140_v12, %v3040_v59  ;;  %v766_v14 = vpop.f32.mrb[11].mxu0 }
 0x1ed   : > { %v767_v15 = vadd.f32 %v3040_v59, %v766_v14 }
 0x1ee   : > { %894 = vst.msk [vmem:[#allocation3 + $0x48] sm:$0xff] %vm412_vm0, %v772_v13 }
 0x1ef   : > { %893 = vst.msk [vmem:[#allocation3 + $0x40] sm:$0xff] %vm412_vm0, %v767_v15 }
 0x1f3   : > { %v2143_v16 = vpop.f32.mrb[12].mxu0 }
 0x1f4   : > { %v782_v17 = vadd.f32 %v2143_v16, %v3040_v59  ;;  %v776_v18 = vpop.f32.mrb[13].mxu0 }
 0x1f5   : > { %v777_v19 = vadd.f32 %v3040_v59, %v776_v18 }
 0x1f6   : > { %896 = vst.msk [vmem:[#allocation3 + $0x58] sm:$0xff] %vm412_vm0, %v782_v17 }
 0x1f7   : > { %895 = vst.msk [vmem:[#allocation3 + $0x50] sm:$0xff] %vm412_vm0, %v777_v19 }
 0x1fb   : > { %v2146_v20 = vpop.f32.mrb[14].mxu0 }
 0x1fc   : > { %v792_v21 = vadd.f32 %v2146_v20, %v3040_v59  ;;  %v786_v22 = vpop.f32.mrb[15].mxu0 }
 0x1fd   : > { %v787_v23 = vadd.f32 %v3040_v59, %v786_v22 }
 0x1fe   : > { %898 = vst.msk [vmem:[#allocation3 + $0x68] sm:$0xff] %vm412_vm0, %v792_v21 }
 0x1ff   : > { %897 = vst.msk [vmem:[#allocation3 + $0x60] sm:$0xff] %vm412_vm0, %v787_v23 }
 0x203   : > { %v2149_v24 = vpop.f32.mrb[0].mxu1 }
 0x204   : > { %v802_v25 = vadd.f32 %v2149_v24, %v3040_v59  ;;  %v796_v26 = vpop.f32.mrb[1].mxu1 }
 0x205   : > { %v797_v27 = vadd.f32 %v3040_v59, %v796_v26 }
 0x206   : > { %900 = vst.msk [vmem:[#allocation3 + $0x78] sm:$0xff] %vm412_vm0, %v802_v25 }
 0x207   : > { %899 = vst.msk [vmem:[#allocation3 + $0x70] sm:$0xff] %vm412_vm0, %v797_v27  ;;  %v2152_v28 = vpop.f32.mrb[2].mxu1 }
 0x208   : > { %v812_v29 = vadd.f32 %v2152_v28, %v3040_v59  ;;  %v806_v30 = vpop.f32.mrb[3].mxu1 }
 0x209   : > { %v807_v31 = vadd.f32 %v3040_v59, %v806_v30 }
 0x20a   : > { %902 = vst.msk [vmem:[#allocation3 + $0x88] sm:$0xff] %vm412_vm0, %v812_v29 }
 0x20b   : > { %901 = vst.msk [vmem:[#allocation3 + $0x80] sm:$0xff] %vm412_vm0, %v807_v31  ;;  %v2155_v32 = vpop.f32.mrb[4].mxu1 }
 0x20c   : > { %v822_v33 = vadd.f32 %v2155_v32, %v3040_v59  ;;  %v816_v34 = vpop.f32.mrb[5].mxu1 }
 0x20d   : > { %v817_v35 = vadd.f32 %v3040_v59, %v816_v34 }
 0x20e   : > { %904 = vst.msk [vmem:[#allocation3 + $0x98] sm:$0xff] %vm412_vm0, %v822_v33 }
 0x20f   : > { %903 = vst.msk [vmem:[#allocation3 + $0x90] sm:$0xff] %vm412_vm0, %v817_v35  ;;  %v2158_v36 = vpop.f32.mrb[6].mxu1 }
 0x210   : > { %v832_v37 = vadd.f32 %v2158_v36, %v3040_v59  ;;  %v826_v38 = vpop.f32.mrb[7].mxu1 }
 0x211   : > { %v827_v39 = vadd.f32 %v3040_v59, %v826_v38 }
 0x212   : > { %906 = vst.msk [vmem:[#allocation3 + $0xa8] sm:$0xff] %vm412_vm0, %v832_v37 }
 0x213   : > { %905 = vst.msk [vmem:[#allocation3 + $0xa0] sm:$0xff] %vm412_vm0, %v827_v39  ;;  %v2161_v40 = vpop.f32.mrb[8].mxu1 }
 0x214   : > { %v842_v41 = vadd.f32 %v2161_v40, %v3040_v59  ;;  %v836_v42 = vpop.f32.mrb[9].mxu1 }
 0x215   : > { %v837_v43 = vadd.f32 %v3040_v59, %v836_v42 }
 0x216   : > { %908 = vst.msk [vmem:[#allocation3 + $0xb8] sm:$0xff] %vm412_vm0, %v842_v41 }
 0x217   : > { %907 = vst.msk [vmem:[#allocation3 + $0xb0] sm:$0xff] %vm412_vm0, %v837_v43  ;;  %v2164_v44 = vpop.f32.mrb[10].mxu1 }
 0x218   : > { %v852_v45 = vadd.f32 %v2164_v44, %v3040_v59  ;;  %v846_v46 = vpop.f32.mrb[11].mxu1 }
 0x219   : > { %v847_v47 = vadd.f32 %v3040_v59, %v846_v46 }
 0x21a   : > { %910 = vst.msk [vmem:[#allocation3 + $0xc8] sm:$0xff] %vm412_vm0, %v852_v45 }
 0x21b   : > { %909 = vst.msk [vmem:[#allocation3 + $0xc0] sm:$0xff] %vm412_vm0, %v847_v47  ;;  %v2167_v48 = vpop.f32.mrb[12].mxu1 }
 0x21c   : > { %v862_v49 = vadd.f32 %v2167_v48, %v3040_v59  ;;  %v856_v50 = vpop.f32.mrb[13].mxu1 }
 0x21d   : > { %v857_v51 = vadd.f32 %v3040_v59, %v856_v50 }
 0x21e   : > { %912 = vst.msk [vmem:[#allocation3 + $0xd8] sm:$0xff] %vm412_vm0, %v862_v49 }
 0x21f   : > { %911 = vst.msk [vmem:[#allocation3 + $0xd0] sm:$0xff] %vm412_vm0, %v857_v51  ;;  %v2170_v52 = vpop.f32.mrb[14].mxu1 }
 0x220   : > { %v872_v53 = vadd.f32 %v2170_v52, %v3040_v59  ;;  %v866_v54 = vpop.f32.mrb[15].mxu1 }
 0x221   : > { %v867_v55 = vadd.f32 %v3040_v59, %v866_v54 }
 0x222   : > { %914 = vst.msk [vmem:[#allocation3 + $0xe8] sm:$0xff] %vm412_vm0, %v872_v53 }
 0x223   : > { %913 = vst.msk [vmem:[#allocation3 + $0xe0] sm:$0xff] %vm412_vm0, %v867_v55  ;;  %v2173_v56 = vpop.f32.mrb[16].mxu1 }
 0x224   : > { %v882_v57 = vadd.f32 %v2173_v56, %v3040_v59  ;;  %v876_v58 = vpop.f32.mrb[17].mxu1 }
 0x225   : > { %v877_v60 = vadd.f32 %v3040_v59, %v876_v58 }
 0x226   : > { %916 = vst.msk [vmem:[#allocation3 + $0xf8] sm:$0xff] %vm412_vm0, %v882_v57 }
 0x227   : > { %915 = vst.msk [vmem:[#allocation3 + $0xf0] sm:$0xff] %vm412_vm0, %v877_v60 }
 0x228 PF: > { %s1966_s24 = sshll.u32 %s2691_s7, 7  ;;  %v2715_v61 = vmov 0.0|0.0   ;;  %vm2716_vm1 = vmmov 0   ;;  %v2717_v62 = vmov 0.0   ;;  %v927_v63 = vld [vmem:[%s3559_s2] sm:$0xff]  ;;  %v2718_v59 = vmov 0  }
 0x229   : > { %2201 = vmatprep.subr.bf16.mxu0 %v2715_v61  ;;  %s918_s26 = sshra.s32 %s1966_s24, 7  ;;  %2182 = vmatprep.mubr.msk.f32.mxu0 %vm2716_vm1, %v2717_v62  ;;  %v926_v6 = vld [vmem:[%s3558_s1] sm:$0xff]  ;;  %vm933_vm2 = vcmask 261120   ;;  %v1008_v7 = vld [vmem:[#allocation2 + $0x8] sm:$0xff]  ;;  %vm1041_vm3 = vcmask 64512   ;;  %s1996_s8 = sshll.u32 %s2691_s7, 5 }
 0x22a   : > { %s1967_s30 = sshll.u32 %s918_s26, 3  ;;  %2390 = vset.pattern.permute.xlu0 %v2718_v59  ;;  %1154 = vmatprep.mubr.f32.mxu1 %v2717_v62  ;;  %v1007_v8 = vld [vmem:[#allocation2] sm:$0xff]  ;;  %s3611_s17 = sld [smem:[#allocation21_spill]] }
 0x22b   : > { %s3113_s3 = scalar_lea.vmem %s2961_s28, %s1967_s30 [#allocation5]  ;;  %930 = vperm.xlu0 %2390, %v927_v63   ;;  %1090 = vmatprep.subr.mxu1 %v1008_v7  ;;  %s3610_s28 = sld [smem:[#allocation18_spill]] }
 0x22c   : > { %v922_v0 = vld [vmem:[%s3113_s3] sm:$0xff]  ;;  %v923_v1 = vld [vmem:[%s3113_s3 + $0x10] sm:$0xff]  ;;  %1091 = vmatpush1.msra.mxu1 %v1007_v8  ;;  %s1785_s26 = sshll.u32 %s2978_s11, 4  ;;  %s3612_s30 = sld [smem:[#allocation27_spill]]  ;;  %s3449_s26 = int_to_ptr.vmem [resolvable:$true] %s1785_s26 }
 0x22d   : > { %v924_v2 = vld [vmem:[%s3113_s3 + $0x20] sm:$0xff]  ;;  %v2202_v3 = vpack.c.bf16 %v923_v1, %v922_v0  ;;  %v925_v4 = vld [vmem:[%s3113_s3 + $0x30] sm:$0xff]  ;;  %s1752_s27 = scalar_lea.sflag [#allocation12], %s2972_s9  ;;  %s2549_s0 = scalar_lea.vmem %s3449_s26, 4096 }
 0x22e   : > { %v2205_v5 = vpack.c.bf16 %v925_v4, %v924_v2  ;;  %p2550_p4 = scmp.ne.s32.totalorder %s3449_s26, %s2549_s0 }
 0x22f   : > { %2203 = vmatpush3.bf16.msra.mxu0 %v2202_v3 }
 0x230   : > { %2204 = vmatprep.subr.bf16.mxu0 %v2715_v61  ;;  %p3613_p2 = scmp.ne.s32.totalorder %s3611_s17, 0 }
 0x231   : > { %s1991_s25 = sshll.u32 %s3610_s28, 6 }
 0x232   : > { %s1782_s29 = sadd.s32 %s1996_s8, %s1991_s25  ;;  %p2551_p12 = pnand %p2550_p4, %p3613_p2 }
 0x233   : > { %2206 = vmatpush3.bf16.msra.mxu0 %v2205_v5  ;;  %s1992_s24 = sshll.u32 %s1782_s29, 7 }
 0x234   : > { %s3447_s23 = scalar_lea.hbm %s3612_s30, %s1992_s24  ;;  %p2552_p3 = pneg %p2551_p12 }
 0x236   : > { %2183 = vmatmul.mubr.msk.f32.vlgmr.msra.gmra.mrb[0].mxu0 %vm933_vm2, %v926_v6 }
 0x2aa   : > { %v931_v9 = vpop.permute.xlu0 %930 }
 0x309   : > { %v1003_v10 = vpop.f32.mrb[0].mxu0 }
 0x30a   : > { %v1004_v11 = vadd.f32 %v1003_v10, %v931_v9  ;;  %v2184_v12 = vpop.f32.mrb[1].mxu0 }
 0x30c   : > { %1009 = vxpose.xlu0.b32.start.end [1/1] (short) %v1004_v11, 128 }
 0x38c   : > { %v1025_v13 = vpop.trf.xlu0 }
 0x38d   : > { %1969 = vmatmul.mubr.msk.f32.vlgmr.msra.gmra.mrb[0].mxu1 %vm1041_vm3, %v1025_v13  ;;  %v1539_v13 = vld [vmem:[#allocation3 + $0x80] sm:$0xff] }
 0x38e   : > { %1160 = vmatprep.mubr.f32.mxu1 %v2717_v62 }
 0x390   : > { %v1026_v14 = vpop.trf.xlu0 }
 0x391   : > { %1970 = vmatmul.mubr.msk.f32.gmra.mrb[2].mxu1 %vm1041_vm3, %v1026_v14  ;;  %v1540_v14 = vld [vmem:[#allocation3 + $0x88] sm:$0xff] }
 0x392   : > { %1166 = vmatprep.mubr.f32.mxu1 %v2717_v62 }
 0x394   : > { %v1027_v15 = vpop.trf.xlu0 }
 0x395   : > { %1971 = vmatmul.mubr.msk.f32.gmra.mrb[4].mxu1 %vm1041_vm3, %v1027_v15  ;;  %v1523_v15 = vld [vmem:[#allocation3] sm:$0xff] }
 0x396   : > { %1172 = vmatprep.mubr.f32.mxu1 %v2717_v62 }
 0x398   : > { %v1028_v16 = vpop.trf.xlu0 }
 0x399   : > { %1972 = vmatmul.mubr.msk.f32.gmra.mrb[6].mxu1 %vm1041_vm3, %v1028_v16  ;;  %v2207_v16 = vpack.c.bf16 %v1540_v14, %v1539_v13 }
 0x39a   : > { %1178 = vmatprep.mubr.f32.mxu1 %v2717_v62 }
 0x39b   : > { %2208 = vmatprep.subr.bf16.mxu0 %v2207_v16  ;;  %2243 = vmatprep.subr.bf16.mxu1 %v2207_v16 }
 0x39c   : > { %v1029_v17 = vpop.trf.xlu0 }
 0x39d   : > { %1973 = vmatmul.mubr.msk.f32.gmra.mrb[8].mxu1 %vm1041_vm3, %v1029_v17  ;;  %v1524_v17 = vld [vmem:[#allocation3 + $0x8] sm:$0xff] }
 0x39e   : > { %1184 = vmatprep.mubr.f32.mxu1 %v2717_v62 }
 0x3a0   : > { %v1030_v18 = vpop.trf.xlu0 }
 0x3a1   : > { %1974 = vmatmul.mubr.msk.f32.gmra.mrb[10].mxu1 %vm1041_vm3, %v1030_v18  ;;  %v1541_v18 = vld [vmem:[#allocation3 + $0x90] sm:$0xff] }
 0x3a2   : > { %1190 = vmatprep.mubr.f32.mxu1 %v2717_v62 }
 0x3a4   : > { %v1031_v19 = vpop.trf.xlu0 }
 0x3a5   : > { %1975 = vmatmul.mubr.msk.f32.gmra.mrb[12].mxu1 %vm1041_vm3, %v1031_v19  ;;  %v1542_v19 = vld [vmem:[#allocation3 + $0x98] sm:$0xff] }
 0x3a6   : > { %1196 = vmatprep.mubr.f32.mxu1 %v2717_v62 }
 0x3a8   : > { %v1032_v20 = vpop.trf.xlu0 }
 0x3a9   : > { %1976 = vmatmul.mubr.msk.f32.gmra.mrb[14].mxu1 %vm1041_vm3, %v1032_v20  ;;  %v2209_v20 = vpack.c.bf16 %v1524_v17, %v1523_v15 }
 0x3aa   : > { %1202 = vmatprep.mubr.f32.mxu1 %v2717_v62 }
 0x3ab   : > { %2210 = vmatpush3.bf16.msra.mxu0 %v2209_v20  ;;  %2251 = vmatpush3.bf16.msra.mxu1 %v2209_v20 }
 0x3ac   : > { %v1033_v21 = vpop.trf.xlu0 }
 0x3ad   : > { %1977 = vmatmul.mubr.msk.f32.gmra.mrb[16].mxu1 %vm1041_vm3, %v1033_v21  ;;  %v2211_v21 = vpack.c.bf16 %v1542_v19, %v1541_v18 }
 0x3ae   : > { %1208 = vmatprep.mubr.f32.mxu1 %v2717_v62 }
 0x3af   : > { %2212 = vmatprep.subr.bf16.mxu0 %v2211_v21  ;;  %2244 = vmatprep.subr.bf16.mxu1 %v2211_v21 }
 0x3b0   : > { %v1034_v22 = vpop.trf.xlu0 }
 0x3b1   : > { %1978 = vmatmul.mubr.msk.f32.gmra.mrb[18].mxu1 %vm1041_vm3, %v1034_v22  ;;  %v1525_v22 = vld [vmem:[#allocation3 + $0x10] sm:$0xff] }
 0x3b2   : > { %1214 = vmatprep.mubr.f32.mxu1 %v2717_v62 }
 0x3b4   : > { %v1035_v23 = vpop.trf.xlu0 }
 0x3b5   : > { %1979 = vmatmul.mubr.msk.f32.gmra.mrb[20].mxu1 %vm1041_vm3, %v1035_v23  ;;  %v1526_v23 = vld [vmem:[#allocation3 + $0x18] sm:$0xff] }
 0x3b6   : > { %1220 = vmatprep.mubr.f32.mxu1 %v2717_v62 }
 0x3b8   : > { %v1036_v24 = vpop.trf.xlu0 }
 0x3b9   : > { %1980 = vmatmul.mubr.msk.f32.gmra.mrb[22].mxu1 %vm1041_vm3, %v1036_v24  ;;  %v1543_v24 = vld [vmem:[#allocation3 + $0xa0] sm:$0xff] }
 0x3ba   : > { %1226 = vmatprep.mubr.f32.mxu1 %v2717_v62 }
 0x3bc   : > { %v1037_v25 = vpop.trf.xlu0 }
 0x3bd   : > { %1981 = vmatmul.mubr.msk.f32.gmra.mrb[24].mxu1 %vm1041_vm3, %v1037_v25  ;;  %v1544_v25 = vld [vmem:[#allocation3 + $0xa8] sm:$0xff] }
 0x3be   : > { %1232 = vmatprep.mubr.f32.mxu1 %v2717_v62 }
 0x3c0   : > { %v1038_v26 = vpop.trf.xlu0 }
 0x3c1   : > { %1982 = vmatmul.mubr.msk.f32.gmra.mrb[26].mxu1 %vm1041_vm3, %v1038_v26  ;;  %v2213_v26 = vpack.c.bf16 %v1526_v23, %v1525_v22 }
 0x3c2   : > { %1238 = vmatprep.mubr.f32.mxu1 %v2717_v62 }
 0x3c3   : > { %2214 = vmatpush3.bf16.msra.mxu0 %v2213_v26  ;;  %2252 = vmatpush3.bf16.msra.mxu1 %v2213_v26 }
 0x3c4   : > { %v1039_v27 = vpop.trf.xlu0 }
 0x3c5   : > { %1983 = vmatmul.mubr.msk.f32.gmra.mrb[28].mxu1 %vm1041_vm3, %v1039_v27  ;;  %v2215_v27 = vpack.c.bf16 %v1544_v25, %v1543_v24 }
 0x3c6   : > { %1244 = vmatprep.mubr.f32.mxu1 %v2717_v62 }
 0x3c7   : > { %2216 = vmatprep.subr.bf16.mxu0 %v2215_v27  ;;  %2245 = vmatprep.subr.bf16.mxu1 %v2215_v27 }
 0x3c8   : > { %v1040_v28 = vpop.trf.xlu0 }
 0x3c9   : > { %1984 = vmatmul.mubr.msk.f32.gmra.mrb[30].mxu1 %vm1041_vm3, %v1040_v28  ;;  %v1527_v28 = vld [vmem:[#allocation3 + $0x20] sm:$0xff] }
 0x460   : > { %v3153_v29 = vpop.f32.mrb[0].mxu1 }
 0x461   : > { %v3155_v30 = vpop.f32.mrb[1].mxu1 }
 0x462   : > { %v1251_v31 = vmax.f32 %v3153_v29, %v3155_v30 }
 0x464   : > { %1252 = vmax.xlane.f32.xlu1 %v1251_v31  ;;  %v3159_v32 = vpop.f32.mrb[2].mxu1  ;;  %v1528_v31 = vld [vmem:[#allocation3 + $0x28] sm:$0xff] }
 0x465   : > { %v3161_v33 = vpop.f32.mrb[3].mxu1 }
 0x466   : > { %v1254_v34 = vmax.f32 %v3159_v32, %v3161_v33 }
 0x468   : > { %1255 = vmax.xlane.f32.xlu1 %v1254_v34  ;;  %v3165_v35 = vpop.f32.mrb[4].mxu1  ;;  %v1545_v34 = vld [vmem:[#allocation3 + $0xb0] sm:$0xff] }
 0x469   : > { %v3167_v36 = vpop.f32.mrb[5].mxu1 }
 0x46a   : > { %v1257_v37 = vmax.f32 %v3165_v35, %v3167_v36 }
 0x46c   : > { %1258 = vmax.xlane.f32.xlu1 %v1257_v37  ;;  %v3171_v38 = vpop.f32.mrb[6].mxu1  ;;  %v1546_v37 = vld [vmem:[#allocation3 + $0xb8] sm:$0xff] }
 0x46d   : > { %v3173_v39 = vpop.f32.mrb[7].mxu1 }
 0x46e   : > { %v1260_v40 = vmax.f32 %v3171_v38, %v3173_v39 }
 0x470   : > { %1261 = vmax.xlane.f32.xlu1 %v1260_v40  ;;  %v3177_v41 = vpop.f32.mrb[8].mxu1  ;;  %v2217_v40 = vpack.c.bf16 %v1528_v31, %v1527_v28 }
 0x471   : > { %v3179_v42 = vpop.f32.mrb[9].mxu1 }
 0x472   : > { %v1263_v43 = vmax.f32 %v3177_v41, %v3179_v42  ;;  %2218 = vmatpush3.bf16.msra.mxu0 %v2217_v40  ;;  %2253 = vmatpush3.bf16.msra.mxu1 %v2217_v40 }
 0x474   : > { %1264 = vmax.xlane.f32.xlu1 %v1263_v43  ;;  %v3183_v44 = vpop.f32.mrb[10].mxu1  ;;  %v2219_v43 = vpack.c.bf16 %v1546_v37, %v1545_v34 }
 0x475   : > { %v3185_v45 = vpop.f32.mrb[11].mxu1 }
 0x476   : > { %v1266_v46 = vmax.f32 %v3183_v44, %v3185_v45  ;;  %2220 = vmatprep.subr.bf16.mxu0 %v2219_v43  ;;  %2246 = vmatprep.subr.bf16.mxu1 %v2219_v43 }
 0x478   : > { %1267 = vmax.xlane.f32.xlu1 %v1266_v46  ;;  %v3189_v47 = vpop.f32.mrb[12].mxu1  ;;  %v1529_v46 = vld [vmem:[#allocation3 + $0x30] sm:$0xff] }
 0x479   : > { %v3191_v48 = vpop.f32.mrb[13].mxu1 }
 0x47a   : > { %v1269_v49 = vmax.f32 %v3189_v47, %v3191_v48 }
 0x47c   : > { %1270 = vmax.xlane.f32.xlu1 %v1269_v49  ;;  %v3195_v50 = vpop.f32.mrb[14].mxu1  ;;  %v1530_v49 = vld [vmem:[#allocation3 + $0x38] sm:$0xff] }
 0x47d   : > { %v3197_v51 = vpop.f32.mrb[15].mxu1 }
 0x47e   : > { %v1272_v52 = vmax.f32 %v3195_v50, %v3197_v51 }
 0x480   : > { %1273 = vmax.xlane.f32.xlu1 %v1272_v52  ;;  %v3201_v53 = vpop.f32.mrb[16].mxu1  ;;  %v1547_v52 = vld [vmem:[#allocation3 + $0xc0] sm:$0xff] }
 0x481   : > { %v3203_v54 = vpop.f32.mrb[17].mxu1 }
 0x482   : > { %v1275_v55 = vmax.f32 %v3201_v53, %v3203_v54 }
 0x484   : > { %1276 = vmax.xlane.f32.xlu1 %v1275_v55  ;;  %v3207_v56 = vpop.f32.mrb[18].mxu1  ;;  %v1548_v55 = vld [vmem:[#allocation3 + $0xc8] sm:$0xff] }
 0x485   : > { %v3209_v57 = vpop.f32.mrb[19].mxu1 }
 0x486   : > { %v1278_v58 = vmax.f32 %v3207_v56, %v3209_v57 }
 0x488   : > { %1279 = vmax.xlane.f32.xlu0 %v1278_v58  ;;  %v3213_v60 = vpop.f32.mrb[20].mxu1  ;;  %v2221_v58 = vpack.c.bf16 %v1530_v49, %v1529_v46 }
 0x489   : > { %v3215_v61 = vpop.f32.mrb[21].mxu1 }
 0x48a   : > { %v1281_v62 = vmax.f32 %v3213_v60, %v3215_v61  ;;  %2222 = vmatpush3.bf16.msra.mxu0 %v2221_v58  ;;  %2254 = vmatpush3.bf16.msra.mxu1 %v2221_v58 }
 0x48c   : > { %1282 = vmax.xlane.f32.xlu1 %v1281_v62  ;;  %v3219_v63 = vpop.f32.mrb[22].mxu1  ;;  %v2223_v62 = vpack.c.bf16 %v1548_v55, %v1547_v52 }
 0x48d   : > { %v3221_v59 = vpop.f32.mrb[23].mxu1 }
 0x48e   : > { %v1284_v0 = vmax.f32 %v3219_v63, %v3221_v59  ;;  %2224 = vmatprep.subr.bf16.mxu0 %v2223_v62  ;;  %2247 = vmatprep.subr.bf16.mxu1 %v2223_v62 }
 0x490   : > { %1285 = vmax.xlane.f32.xlu1 %v1284_v0  ;;  %v3225_v1 = vpop.f32.mrb[24].mxu1  ;;  %v1531_v0 = vld [vmem:[#allocation3 + $0x40] sm:$0xff] }
 0x491   : > { %v3227_v2 = vpop.f32.mrb[25].mxu1 }
 0x492   : > { %v1287_v3 = vmax.f32 %v3225_v1, %v3227_v2 }
 0x494   : > { %1288 = vmax.xlane.f32.xlu1 %v1287_v3  ;;  %v3231_v4 = vpop.f32.mrb[26].mxu1  ;;  %v1532_v3 = vld [vmem:[#allocation3 + $0x48] sm:$0xff] }
 0x495   : > { %v3233_v5 = vpop.f32.mrb[27].mxu1 }
 0x496   : > { %v1290_v6 = vmax.f32 %v3231_v4, %v3233_v5 }
 0x498   : > { %1291 = vmax.xlane.f32.xlu1 %v1290_v6  ;;  %v3237_v7 = vpop.f32.mrb[28].mxu1  ;;  %v2225_v6 = vpack.c.bf16 %v1532_v3, %v1531_v0 }
 0x499   : > { %v3239_v8 = vpop.f32.mrb[29].mxu1 }
 0x49a   : > { %v1293_v9 = vmax.f32 %v3237_v7, %v3239_v8  ;;  %2226 = vmatpush3.bf16.msra.mxu0 %v2225_v6  ;;  %2255 = vmatpush3.bf16.msra.mxu1 %v2225_v6 }
 0x49c   : > { %1294 = vmax.xlane.f32.xlu1 %v1293_v9  ;;  %v3243_v10 = vpop.f32.mrb[30].mxu1 }
 0x49d   : > { %v3245_v11 = vpop.f32.mrb[31].mxu1 }
 0x49e   : > { %v1296_v12 = vmax.f32 %v3243_v10, %v3245_v11 }
 0x4a0   : > { %1297 = vmax.xlane.f32.xlu1 %v1296_v12 }
 0x4f1   : > { %v1253_v9 = vpop.xlane.xlu1 %1252 }
 0x4f2   : > { %v1299_v12 = vsub.f32 %v3153_v29, %v1253_v9  ;;  %v1300_v13 = vsub.f32 %v3155_v30, %v1253_v9 }
 0x4f4   : > { %v1331_v14 = vmul.f32 1.442695, %v1299_v12  ;;  %v1333_v15 = vmul.f32 1.442695, %v1300_v13 }
 0x4f5   : > { %v1256_v16 = vpop.xlane.xlu1 %1255 }
 0x4f6   : > { %2391 = vpow2.f32 %v1331_v14  ;;  %v1301_v17 = vsub.f32 %v3159_v32, %v1256_v16  ;;  %v1302_v18 = vsub.f32 %v3161_v33, %v1256_v16 }
 0x4f7   : > { %2393 = vpow2.f32 %v1333_v15 }
 0x4f8   : > { %v1335_v19 = vmul.f32 1.442695, %v1301_v17  ;;  %v1337_v20 = vmul.f32 1.442695, %v1302_v18 }
 0x4f9   : > { %v1259_v21 = vpop.xlane.xlu1 %1258 }
 0x4fa   : > { %2395 = vpow2.f32 %v1335_v19  ;;  %v1303_v22 = vsub.f32 %v3165_v35, %v1259_v21  ;;  %v1304_v23 = vsub.f32 %v3167_v36, %v1259_v21  ;;  %v1550_v21 = vld [vmem:[#allocation3 + $0xd8] sm:$0xff] }
 0x4fb   : > { %2397 = vpow2.f32 %v1337_v20  ;;  %v1549_v20 = vld [vmem:[#allocation3 + $0xd0] sm:$0xff] }
 0x4fc   : > { %v1339_v29 = vmul.f32 1.442695, %v1303_v22  ;;  %v1341_v30 = vmul.f32 1.442695, %v1304_v23  ;;  %v1533_v23 = vld [vmem:[#allocation3 + $0x50] sm:$0xff] }
 0x4fd   : > { %v1262_v24 = vpop.xlane.xlu1 %1261 }
 0x4fe   : > { %2399 = vpow2.f32 %v1339_v29  ;;  %v1305_v25 = vsub.f32 %v3171_v38, %v1262_v24  ;;  %v1306_v32 = vsub.f32 %v3173_v39, %v1262_v24  ;;  %v1534_v29 = vld [vmem:[#allocation3 + $0x58] sm:$0xff] }
 0x4ff   : > { %2401 = vpow2.f32 %v1341_v30  ;;  %v2227_v30 = vpack.c.bf16 %v1550_v21, %v1549_v20  ;;  %v2229_v24 = vpack.c.bf16 %v1534_v29, %v1533_v23 }
 0x500   : > { %v3257_v33 = vpop.eup %2391  ;;  %v1343_v26 = vmul.f32 1.442695, %v1305_v25  ;;  %v1345_v27 = vmul.f32 1.442695, %v1306_v32 }
 0x501   : > { %v3259_v28 = vpop.eup %2393  ;;  %v1265_v31 = vpop.xlane.xlu1 %1264  ;;  %2228 = vmatprep.subr.bf16.mxu0 %v2227_v30  ;;  %2248 = vmatprep.subr.bf16.mxu1 %v2227_v30 }
 0x502   : > { %2403 = vpow2.f32 %v1343_v26  ;;  %v1307_v35 = vsub.f32 %v3177_v41, %v1265_v31  ;;  %v1308_v36 = vsub.f32 %v3179_v42, %v1265_v31  ;;  %v1395_v34 = vadd.f32 %v3259_v28, %v3257_v33  ;;  %2230 = vmatpush3.bf16.msra.mxu0 %v2229_v24  ;;  %2256 = vmatpush3.bf16.msra.mxu1 %v2229_v24 }
 0x503   : > { %2405 = vpow2.f32 %v1345_v27 }
 0x504   : > { %v3265_v38 = vpop.eup %2395  ;;  %v1347_v39 = vmul.f32 1.442695, %v1307_v35  ;;  %v1349_v37 = vmul.f32 1.442695, %v1308_v36  ;;  %1396 = vadd.xlane.f32.xlu1 %v1395_v34  ;;  %v1552_v35 = vld [vmem:[#allocation3 + $0xe8] sm:$0xff] }
 0x505   : > { %v3267_v40 = vpop.eup %2397  ;;  %v1268_v43 = vpop.xlane.xlu1 %1267 }
 0x506   : > { %2407 = vpow2.f32 %v1347_v39  ;;  %v1309_v46 = vsub.f32 %v3183_v44, %v1268_v43  ;;  %v1310_v49 = vsub.f32 %v3185_v45, %v1268_v43  ;;  %v1398_v41 = vadd.f32 %v3267_v40, %v3265_v38  ;;  %v1535_v39 = vld [vmem:[#allocation3 + $0x60] sm:$0xff] }
 0x507   : > { %2409 = vpow2.f32 %v1349_v37  ;;  %v1536_v37 = vld [vmem:[#allocation3 + $0x68] sm:$0xff] }
 0x508   : > { %v3273_v42 = vpop.eup %2399  ;;  %v1351_v52 = vmul.f32 1.442695, %v1309_v46  ;;  %v1353_v55 = vmul.f32 1.442695, %v1310_v49  ;;  %1399 = vadd.xlane.f32.xlu1 %v1398_v41  ;;  %v2233_v46 = vpack.c.bf16 %v1536_v37, %v1535_v39 }
 0x509   : > { %v3275_v58 = vpop.eup %2401  ;;  %v1271_v62 = vpop.xlane.xlu1 %1270 }
 0x50a   : > { %2411 = vpow2.f32 %v1351_v52  ;;  %v1311_v0 = vsub.f32 %v3189_v47, %v1271_v62  ;;  %v1312_v3 = vsub.f32 %v3191_v48, %v1271_v62  ;;  %v1401_v44 = vadd.f32 %v3275_v58, %v3273_v42  ;;  %v1554_v62 = vld [vmem:[#allocation3 + $0xf8] sm:$0xff] }
 0x50b   : > { %2413 = vpow2.f32 %v1353_v55 }
 0x50c   : > { %v3281_v45 = vpop.eup %2403  ;;  %v1355_v6 = vmul.f32 1.442695, %v1311_v0  ;;  %v1357_v9 = vmul.f32 1.442695, %v1312_v3  ;;  %1402 = vadd.xlane.f32.xlu1 %v1401_v44 }
 0x50d   : > { %v3283_v12 = vpop.eup %2405  ;;  %v1274_v13 = vpop.xlane.xlu1 %1273 }
 0x50e   : > { %2415 = vpow2.f32 %v1355_v6  ;;  %v1313_v14 = vsub.f32 %v3195_v50, %v1274_v13  ;;  %v1314_v15 = vsub.f32 %v3197_v51, %v1274_v13  ;;  %v1404_v47 = vadd.f32 %v3283_v12, %v3281_v45  ;;  %v1537_v6 = vld [vmem:[#allocation3 + $0x70] sm:$0xff] }
 0x50f   : > { %2417 = vpow2.f32 %v1357_v9  ;;  %v1538_v9 = vld [vmem:[#allocation3 + $0x78] sm:$0xff] }
 0x510   : > { %v3289_v48 = vpop.eup %2407  ;;  %v1359_v16 = vmul.f32 1.442695, %v1313_v14  ;;  %v1361_v17 = vmul.f32 1.442695, %v1314_v15  ;;  %1405 = vadd.xlane.f32.xlu1 %v1404_v47  ;;  %v2237_v14 = vpack.c.bf16 %v1538_v9, %v1537_v6 }
 0x511   : > { %v3291_v18 = vpop.eup %2409  ;;  %v1277_v19 = vpop.xlane.xlu1 %1276 }
 0x512   : > { %2419 = vpow2.f32 %v1359_v16  ;;  %v1315_v22 = vsub.f32 %v3201_v53, %v1277_v19  ;;  %v1316_v50 = vsub.f32 %v3203_v54, %v1277_v19  ;;  %v1407_v51 = vadd.f32 %v3291_v18, %v3289_v48  ;;  %v1551_v53 = vld [vmem:[#allocation3 + $0xe0] sm:$0xff] }
 0x513   : > { %2421 = vpow2.f32 %v1361_v17  ;;  %v2231_v43 = vpack.c.bf16 %v1552_v35, %v1551_v53 }
 0x514   : > { %v3297_v25 = vpop.eup %2411  ;;  %v1363_v32 = vmul.f32 1.442695, %v1315_v22  ;;  %v1365_v26 = vmul.f32 1.442695, %v1316_v50  ;;  %1408 = vadd.xlane.f32.xlu1 %v1407_v51 }
 0x515   : > { %v3299_v27 = vpop.eup %2413  ;;  %v1280_v31 = vpop.xlane.xlu0 %1279  ;;  %2232 = vmatprep.subr.bf16.mxu0 %v2231_v43  ;;  %2249 = vmatprep.subr.bf16.mxu1 %v2231_v43 }
 0x516   : > { %2423 = vpow2.f32 %v1363_v32  ;;  %v1317_v54 = vsub.f32 %v3207_v56, %v1280_v31  ;;  %v1318_v36 = vsub.f32 %v3209_v57, %v1280_v31  ;;  %v1410_v34 = vadd.f32 %v3299_v27, %v3297_v25  ;;  %v1553_v57 = vld [vmem:[#allocation3 + $0xf0] sm:$0xff]  ;;  %2234 = vmatpush3.bf16.msra.mxu0 %v2233_v46  ;;  %2257 = vmatpush3.bf16.msra.mxu1 %v2233_v46 }
 0x517   : > { %2425 = vpow2.f32 %v1365_v26  ;;  %v2235_v13 = vpack.c.bf16 %v1554_v62, %v1553_v57 }
 0x518   : > { %v3305_v49 = vpop.eup %2415  ;;  %v1367_v41 = vmul.f32 1.442695, %v1317_v54  ;;  %v1369_v52 = vmul.f32 1.442695, %v1318_v36  ;;  %1411 = vadd.xlane.f32.xlu1 %v1410_v34 }
 0x519   : > { %v3307_v55 = vpop.eup %2417  ;;  %v1283_v56 = vpop.xlane.xlu1 %1282  ;;  %2236 = vmatprep.subr.bf16.mxu0 %v2235_v13  ;;  %2250 = vmatprep.subr.bf16.mxu1 %v2235_v13 }
 0x51a   : > { %2427 = vpow2.f32 %v1367_v41  ;;  %v1319_v0 = vsub.f32 %v3213_v60, %v1283_v56  ;;  %v1320_v3 = vsub.f32 %v3215_v61, %v1283_v56  ;;  %v1413_v44 = vadd.f32 %v3307_v55, %v3305_v49  ;;  %2238 = vmatpush3.bf16.msra.mxu0 %v2237_v14  ;;  %2258 = vmatpush3.bf16.msra.mxu1 %v2237_v14 }
 0x51b   : > { %2429 = vpow2.f32 %v1369_v52 }
 0x51c   : > { %v3313_v15 = vpop.eup %2419  ;;  %v1371_v47 = vmul.f32 1.442695, %v1319_v0  ;;  %v1373_v16 = vmul.f32 1.442695, %v1320_v3  ;;  %1414 = vadd.xlane.f32.xlu1 %v1413_v44 }
 0x51d   : > { %v3315_v17 = vpop.eup %2421  ;;  %v1286_v60 = vpop.xlane.xlu1 %1285 }
 0x51e   : > { %2431 = vpow2.f32 %v1371_v47  ;;  %v1321_v61 = vsub.f32 %v3219_v63, %v1286_v60  ;;  %v1322_v19 = vsub.f32 %v3221_v59, %v1286_v60  ;;  %v1416_v20 = vadd.f32 %v3315_v17, %v3313_v15 }
 0x51f   : > { %2433 = vpow2.f32 %v1373_v16 }
 0x520   : > { %v3321_v21 = vpop.eup %2423  ;;  %v1375_v22 = vmul.f32 1.442695, %v1321_v61  ;;  %v1377_v50 = vmul.f32 1.442695, %v1322_v19  ;;  %1417 = vadd.xlane.f32.xlu1 %v1416_v20 }
 0x521   : > { %v3323_v51 = vpop.eup %2425  ;;  %v1289_v23 = vpop.xlane.xlu1 %1288 }
 0x522   : > { %2435 = vpow2.f32 %v1375_v22  ;;  %v1323_v29 = vsub.f32 %v3225_v1, %v1289_v23  ;;  %v1324_v63 = vsub.f32 %v3227_v2, %v1289_v23  ;;  %v1419_v59 = vadd.f32 %v3323_v51, %v3321_v21 }
 0x523   : > { %2437 = vpow2.f32 %v1377_v50 }
 0x524   : > { %v3329_v30 = vpop.eup %2427  ;;  %v1379_v24 = vmul.f32 1.442695, %v1323_v29  ;;  %v1381_v32 = vmul.f32 1.442695, %v1324_v63  ;;  %1420 = vadd.xlane.f32.xlu1 %v1419_v59 }
 0x525   : > { %v3331_v26 = vpop.eup %2429  ;;  %v1292_v31 = vpop.xlane.xlu1 %1291 }
 0x526   : > { %2439 = vpow2.f32 %v1379_v24  ;;  %v1325_v53 = vsub.f32 %v3231_v4, %v1292_v31  ;;  %v1326_v35 = vsub.f32 %v3233_v5, %v1292_v31  ;;  %v1422_v1 = vadd.f32 %v3331_v26, %v3329_v30 }
 0x527   : > { %2441 = vpow2.f32 %v1381_v32 }
 0x528   : > { %v3337_v2 = vpop.eup %2431  ;;  %v1383_v54 = vmul.f32 1.442695, %v1325_v53  ;;  %v1385_v36 = vmul.f32 1.442695, %v1326_v35  ;;  %1423 = vadd.xlane.f32.xlu1 %v1422_v1 }
 0x529   : > { %v3339_v34 = vpop.eup %2433  ;;  %v1295_v39 = vpop.xlane.xlu1 %1294 }
 0x52a   : > { %2443 = vpow2.f32 %v1383_v54  ;;  %v1327_v37 = vsub.f32 %v3237_v7, %v1295_v39  ;;  %v1328_v43 = vsub.f32 %v3239_v8, %v1295_v39  ;;  %v1425_v4 = vadd.f32 %v3339_v34, %v3337_v2 }
 0x52b   : > { %2445 = vpow2.f32 %v1385_v36 }
 0x52c   : > { %v3345_v5 = vpop.eup %2435  ;;  %v1387_v46 = vmul.f32 1.442695, %v1327_v37  ;;  %v1389_v41 = vmul.f32 1.442695, %v1328_v43  ;;  %1426 = vadd.xlane.f32.xlu1 %v1425_v4 }
 0x52d   : > { %v3347_v52 = vpop.eup %2437  ;;  %v1298_v56 = vpop.xlane.xlu1 %1297 }
 0x52e   : > { %2447 = vpow2.f32 %v1387_v46  ;;  %v1329_v57 = vsub.f32 %v3243_v10, %v1298_v56  ;;  %v1330_v62 = vsub.f32 %v3245_v11, %v1298_v56  ;;  %v1428_v7 = vadd.f32 %v3347_v52, %v3345_v5 }
 0x52f   : > { %2449 = vpow2.f32 %v1389_v41 }
 0x530   : > { %v3353_v8 = vpop.eup %2439  ;;  %v1391_v0 = vmul.f32 1.442695, %v1329_v57  ;;  %v1393_v3 = vmul.f32 1.442695, %v1330_v62  ;;  %1429 = vadd.xlane.f32.xlu1 %v1428_v7 }
 0x531   : > { %v3355_v44 = vpop.eup %2441 }
 0x532   : > { %2451 = vpow2.f32 %v1391_v0  ;;  %v1431_v6 = vadd.f32 %v3355_v44, %v3353_v8 }
 0x533   : > { %2453 = vpow2.f32 %v1393_v3 }
 0x534   : > { %v3359_v9 = vpop.eup %2443  ;;  %1432 = vadd.xlane.f32.xlu1 %v1431_v6 }
 0x535   : > { %v3361_v10 = vpop.eup %2445 }
 0x536   : > { %v1434_v11 = vadd.f32 %v3361_v10, %v3359_v9 }
 0x538   : > { %v3365_v13 = vpop.eup %2447  ;;  %1435 = vadd.xlane.f32.xlu1 %v1434_v11 }
 0x539   : > { %v3367_v14 = vpop.eup %2449 }
 0x53a   : > { %v1437_v47 = vadd.f32 %v3367_v14, %v3365_v13 }
 0x53c   : > { %v3371_v16 = vpop.eup %2451  ;;  %1438 = vadd.xlane.f32.xlu1 %v1437_v47 }
 0x53d   : > { %v3373_v60 = vpop.eup %2453 }
 0x53e   : > { %v1440_v61 = vadd.f32 %v3373_v60, %v3371_v16 }
 0x540   : > { %1441 = vadd.xlane.f32.xlu1 %v1440_v61 }
 0x591   : > { %v1397_v19 = vpop.xlane.xlu1 %1396 }
 0x592   : > { %2455 = vrcp.f32 %v1397_v19 }
 0x595   : > { %v1400_v20 = vpop.xlane.xlu1 %1399 }
 0x596   : > { %2457 = vrcp.f32 %v1400_v20 }
 0x599   : > { %v1403_v22 = vpop.xlane.xlu1 %1402 }
 0x59a   : > { %2459 = vrcp.f32 %v1403_v22 }
 0x59c   : > { %v2456_v50 = vpop.eup %2455 }
 0x59d   : > { %v1406_v23 = vpop.xlane.xlu1 %1405  ;;  %v1460_v29 = vmul.f32 %v2456_v50, %v3259_v28  ;;  %v1459_v63 = vmul.f32 %v2456_v50, %v3257_v33 }
 0x59e   : > { %2461 = vrcp.f32 %v1406_v23 }
 0x59f   : > { %1492 = vst [vmem:[%s2978_s11 + $0x8] sm:$0xff] %v1460_v29  ;;  %1619 = vmatprep.mubr.f32.mxu0 %v1460_v29  ;;  %1491 = vst [vmem:[%s2978_s11] sm:$0xff] %v1459_v63 }
 0x5a0   : > { %v2458_v59 = vpop.eup %2457  ;;  %1620 = vmatmul.mubr.f32.vlgmr.msra.gmra.mrb[2].mxu0 %v1459_v63 }
 0x5a1   : > { %v1409_v24 = vpop.xlane.xlu1 %1408  ;;  %v1462_v32 = vmul.f32 %v2458_v59, %v3267_v40  ;;  %v1461_v31 = vmul.f32 %v2458_v59, %v3265_v38 }
 0x5a2   : > { %2463 = vrcp.f32 %v1409_v24 }
 0x5a3   : > { %1494 = vst [vmem:[%s2978_s11 + $0x18] sm:$0xff] %v1462_v32  ;;  %1624 = vmatprep.mubr.f32.mxu0 %v1462_v32  ;;  %1493 = vst [vmem:[%s2978_s11 + $0x10] sm:$0xff] %v1461_v31 }
 0x5a4   : > { %v2460_v28 = vpop.eup %2459  ;;  %1625 = vmatmul.mubr.f32.gmra.mrb[4].mxu0 %v1461_v31 }
 0x5a5   : > { %v1412_v33 = vpop.xlane.xlu1 %1411  ;;  %v1464_v53 = vmul.f32 %v2460_v28, %v3275_v58  ;;  %v1463_v35 = vmul.f32 %v2460_v28, %v3273_v42 }
 0x5a6   : > { %2465 = vrcp.f32 %v1412_v33 }
 0x5a7   : > { %1496 = vst [vmem:[%s2978_s11 + $0x28] sm:$0xff] %v1464_v53  ;;  %1629 = vmatprep.mubr.f32.mxu0 %v1464_v53  ;;  %1495 = vst [vmem:[%s2978_s11 + $0x20] sm:$0xff] %v1463_v35 }
 0x5a8   : > { %v2462_v40 = vpop.eup %2461  ;;  %1630 = vmatmul.mubr.f32.gmra.mrb[6].mxu0 %v1463_v35 }
 0x5a9   : > { %v1415_v38 = vpop.xlane.xlu1 %1414  ;;  %v1466_v1 = vmul.f32 %v2462_v40, %v3283_v12  ;;  %v1465_v54 = vmul.f32 %v2462_v40, %v3281_v45 }
 0x5aa   : > { %2467 = vrcp.f32 %v1415_v38 }
 0x5ab   : > { %1498 = vst [vmem:[%s2978_s11 + $0x38] sm:$0xff] %v1466_v1  ;;  %1634 = vmatprep.mubr.f32.mxu0 %v1466_v1  ;;  %1497 = vst [vmem:[%s2978_s11 + $0x30] sm:$0xff] %v1465_v54 }
 0x5ac   : > { %v2464_v58 = vpop.eup %2463  ;;  %1635 = vmatmul.mubr.f32.gmra.mrb[8].mxu0 %v1465_v54 }
 0x5ad   : > { %v1418_v42 = vpop.xlane.xlu1 %1417  ;;  %v1468_v36 = vmul.f32 %v2464_v58, %v3291_v18  ;;  %v1467_v39 = vmul.f32 %v2464_v58, %v3289_v48 }
 0x5ae   : > { %2469 = vrcp.f32 %v1418_v42 }
 0x5af   : > { %1500 = vst [vmem:[%s2978_s11 + $0x48] sm:$0xff] %v1468_v36  ;;  %1639 = vmatprep.mubr.f32.mxu0 %v1468_v36  ;;  %1499 = vst [vmem:[%s2978_s11 + $0x40] sm:$0xff] %v1467_v39 }
 0x5b0   : > { %v2466_v12 = vpop.eup %2465  ;;  %1640 = vmatmul.mubr.f32.gmra.mrb[10].mxu0 %v1467_v39 }
 0x5b1   : > { %v1421_v45 = vpop.xlane.xlu1 %1420  ;;  %v1470_v37 = vmul.f32 %v2466_v12, %v3299_v27  ;;  %v1469_v43 = vmul.f32 %v2466_v12, %v3297_v25 }
 0x5b2   : > { %2471 = vrcp.f32 %v1421_v45 }
 0x5b3   : > { %1502 = vst [vmem:[%s2978_s11 + $0x58] sm:$0xff] %v1470_v37  ;;  %1644 = vmatprep.mubr.f32.mxu0 %v1470_v37  ;;  %1501 = vst [vmem:[%s2978_s11 + $0x50] sm:$0xff] %v1469_v43 }
 0x5b4   : > { %v2468_v18 = vpop.eup %2467  ;;  %1645 = vmatmul.mubr.f32.gmra.mrb[12].mxu0 %v1469_v43 }
 0x5b5   : > { %v1424_v48 = vpop.xlane.xlu1 %1423  ;;  %v1472_v4 = vmul.f32 %v2468_v18, %v3307_v55  ;;  %v1471_v46 = vmul.f32 %v2468_v18, %v3305_v49 }
 0x5b6   : > { %2473 = vrcp.f32 %v1424_v48 }
 0x5b7   : > { %1504 = vst [vmem:[%s2978_s11 + $0x68] sm:$0xff] %v1472_v4  ;;  %1649 = vmatprep.mubr.f32.mxu0 %v1472_v4  ;;  %1503 = vst [vmem:[%s2978_s11 + $0x60] sm:$0xff] %v1471_v46 }
 0x5b8   : > { %v2470_v27 = vpop.eup %2469  ;;  %1650 = vmatmul.mubr.f32.gmra.mrb[14].mxu0 %v1471_v46 }
 0x5b9   : > { %v1427_v25 = vpop.xlane.xlu1 %1426  ;;  %v1474_v41 = vmul.f32 %v2470_v27, %v3315_v17  ;;  %v1473_v56 = vmul.f32 %v2470_v27, %v3313_v15 }
 0x5ba   : > { %2475 = vrcp.f32 %v1427_v25 }
 0x5bb   : > { %1506 = vst [vmem:[%s2978_s11 + $0x78] sm:$0xff] %v1474_v41  ;;  %1654 = vmatprep.mubr.f32.mxu0 %v1474_v41  ;;  %1505 = vst [vmem:[%s2978_s11 + $0x70] sm:$0xff] %v1473_v56 }
 0x5bc   : > { %v2472_v55 = vpop.eup %2471  ;;  %1655 = vmatmul.mubr.f32.gmra.mrb[16].mxu0 %v1473_v56 }
 0x5bd   : > { %v1430_v49 = vpop.xlane.xlu1 %1429  ;;  %v1476_v57 = vmul.f32 %v2472_v55, %v3323_v51  ;;  %v1475_v62 = vmul.f32 %v2472_v55, %v3321_v21 }
 0x5be   : > { %2477 = vrcp.f32 %v1430_v49 }
 0x5bf   : > { %1508 = vst [vmem:[%s2978_s11 + $0x88] sm:$0xff] %v1476_v57  ;;  %1659 = vmatprep.mubr.f32.mxu0 %v1476_v57  ;;  %1507 = vst [vmem:[%s2978_s11 + $0x80] sm:$0xff] %v1475_v62 }
 0x5c0   : > { %v2474_v17 = vpop.eup %2473  ;;  %1660 = vmatmul.mubr.f32.gmra.mrb[18].mxu0 %v1475_v62 }
 0x5c1   : > { %v1433_v15 = vpop.xlane.xlu1 %1432  ;;  %v1478_v7 = vmul.f32 %v2474_v17, %v3331_v26  ;;  %v1477_v0 = vmul.f32 %v2474_v17, %v3329_v30 }
 0x5c2   : > { %2479 = vrcp.f32 %v1433_v15 }
 0x5c3   : > { %1510 = vst [vmem:[%s2978_s11 + $0x98] sm:$0xff] %v1478_v7  ;;  %1664 = vmatprep.mubr.f32.mxu0 %v1478_v7  ;;  %1509 = vst [vmem:[%s2978_s11 + $0x90] sm:$0xff] %v1477_v0 }
 0x5c4   : > { %v2476_v51 = vpop.eup %2475  ;;  %1665 = vmatmul.mubr.f32.gmra.mrb[20].mxu0 %v1477_v0 }
 0x5c5   : > { %v1436_v21 = vpop.xlane.xlu1 %1435  ;;  %v1480_v3 = vmul.f32 %v2476_v51, %v3339_v34  ;;  %v1479_v6 = vmul.f32 %v2476_v51, %v3337_v2 }
 0x5c6   : > { %2481 = vrcp.f32 %v1436_v21 }
 0x5c7   : > { %1512 = vst [vmem:[%s2978_s11 + $0xa8] sm:$0xff] %v1480_v3  ;;  %1669 = vmatprep.mubr.f32.mxu0 %v1480_v3  ;;  %1511 = vst [vmem:[%s2978_s11 + $0xa0] sm:$0xff] %v1479_v6 }
 0x5c8   : > { %v2478_v26 = vpop.eup %2477  ;;  %1670 = vmatmul.mubr.f32.gmra.mrb[22].mxu0 %v1479_v6 }
 0x5c9   : > { %v1439_v30 = vpop.xlane.xlu1 %1438  ;;  %v1482_v11 = vmul.f32 %v2478_v26, %v3347_v52  ;;  %v1481_v47 = vmul.f32 %v2478_v26, %v3345_v5 }
 0x5ca   : > { %2483 = vrcp.f32 %v1439_v30 }
 0x5cb   : > { %1514 = vst [vmem:[%s2978_s11 + $0xb8] sm:$0xff] %v1482_v11  ;;  %1674 = vmatprep.mubr.f32.mxu0 %v1482_v11  ;;  %1513 = vst [vmem:[%s2978_s11 + $0xb0] sm:$0xff] %v1481_v47 }
 0x5cc   : > { %v2480_v2 = vpop.eup %2479  ;;  %1675 = vmatmul.mubr.f32.gmra.mrb[24].mxu0 %v1481_v47 }
 0x5cd   : > { %v1483_v34 = vmul.f32 %v2480_v2, %v3353_v8  ;;  %v1442_v61 = vpop.xlane.xlu1 %1441  ;;  %v1484_v19 = vmul.f32 %v2480_v2, %v3355_v44 }
 0x5ce   : > { %2485 = vrcp.f32 %v1442_v61 }
 0x5cf   : > { %1515 = vst [vmem:[%s2978_s11 + $0xc0] sm:$0xff] %v1483_v34  ;;  %1516 = vst [vmem:[%s2978_s11 + $0xc8] sm:$0xff] %v1484_v19  ;;  %1679 = vmatprep.mubr.f32.mxu1 %v1484_v19 }
 0x5d0   : > { %v2482_v5 = vpop.eup %2481  ;;  %1680 = vmatmul.mubr.f32.vlgmr.msra.gmra.mrb[32].mxu1 %v1483_v34 }
 0x5d1   : > { %v1486_v52 = vmul.f32 %v2482_v5, %v3361_v10  ;;  %v1485_v20 = vmul.f32 %v2482_v5, %v3359_v9 }
 0x5d3   : > { %1518 = vst [vmem:[%s2978_s11 + $0xd8] sm:$0xff] %v1486_v52  ;;  %1684 = vmatprep.mubr.f32.mxu1 %v1486_v52  ;;  %1517 = vst [vmem:[%s2978_s11 + $0xd0] sm:$0xff] %v1485_v20 }
 0x5d4   : > { %v2484_v8 = vpop.eup %2483  ;;  %1685 = vmatmul.mubr.f32.gmra.mrb[34].mxu1 %v1485_v20 }
 0x5d5   : > { %v1488_v44 = vmul.f32 %v2484_v8, %v3367_v14  ;;  %v1487_v22 = vmul.f32 %v2484_v8, %v3365_v13 }
 0x5d7   : > { %1520 = vst [vmem:[%s2978_s11 + $0xe8] sm:$0xff] %v1488_v44  ;;  %1689 = vmatprep.mubr.f32.mxu1 %v1488_v44  ;;  %1519 = vst [vmem:[%s2978_s11 + $0xe0] sm:$0xff] %v1487_v22 }
 0x5d8   : > { %v2486_v50 = vpop.eup %2485  ;;  %1690 = vmatmul.mubr.f32.gmra.mrb[36].mxu1 %v1487_v22 }
 0x5d9   : > { %v1490_v10 = vmul.f32 %v2486_v50, %v3373_v60  ;;  %v1489_v23 = vmul.f32 %v2486_v50, %v3371_v16 }
 0x5db   : > { %1522 = vst [vmem:[%s2978_s11 + $0xf8] sm:$0xff] %v1490_v10  ;;  %1694 = vmatprep.mubr.f32.mxu1 %v1490_v10  ;;  %1521 = vst [vmem:[%s2978_s11 + $0xf0] sm:$0xff] %v1489_v23  ;;  %s2719_s11 = smov [#allocation11]  }
 0x5dc   : > { %1695 = vmatmul.mubr.f32.gmra.mrb[38].mxu1 %v1489_v23  ;;  %s2553_s8 = sshll.u32 %s2719_s11, 4  ;;  %s2554_s8 = int_to_ptr.vmem [resolvable:$false] %s2553_s8 }
 0x5dd   : > { %s2555_s25 = scalar_lea.vmem %s2554_s8, 8192  ;;  %p2556_p6 = scmp.lt.s32.totalorder %s3449_s26, %s2554_s8 }
 0x5de   : > { %p2557_p10 = scmp.lt.s32.totalorder %s2555_s25, %s2549_s0 }
 0x5e0   : > { %p2558_p0 = por %p2557_p10, %p2556_p6 }
 0x5e2   : > { %p2559_p8 = pnand %p2558_p0, %p2552_p3 }
 0x673   : > { %v2070_v9 = vpop.f32.mrb[2].mxu0 }
 0x674   : > { %v2071_v29 = vpop.f32.mrb[3].mxu0 }
 0x675   : > { %v2072_v63 = vadd.f32 %v2071_v29, %v2070_v9 }
 0x677   : > { %v2073_v59 = vpop.f32.mrb[4].mxu0  ;;  %1701 = vxpose.xlu1.b32.start [1/16] (narrow) %v2072_v63, 32 }
 0x678   : > { %v2074_v14 = vpop.f32.mrb[5].mxu0 }
 0x679   : > { %v2075_v13 = vadd.f32 %v2074_v14, %v2073_v59 }
 0x67b   : > { %v2076_v24 = vpop.f32.mrb[6].mxu0  ;;  %1702 = vxpose.xlu1.b32.cont [2/16] (narrow) %v2075_v13, 32 }
 0x67c   : > { %v2077_v32 = vpop.f32.mrb[7].mxu0 }
 0x67d   : > { %v2078_v31 = vadd.f32 %v2077_v32, %v2076_v24 }
 0x67f   : > { %v2079_v60 = vpop.f32.mrb[8].mxu0  ;;  %1703 = vxpose.xlu1.b32.cont [3/16] (narrow) %v2078_v31, 32 }
 0x680   : > { %v2080_v16 = vpop.f32.mrb[9].mxu0 }
 0x681   : > { %v2081_v28 = vadd.f32 %v2080_v16, %v2079_v60 }
 0x683   : > { %v2082_v33 = vpop.f32.mrb[10].mxu0  ;;  %1704 = vxpose.xlu1.b32.cont [4/16] (narrow) %v2081_v28, 32 }
 0x684   : > { %v2083_v53 = vpop.f32.mrb[11].mxu0 }
 0x685   : > { %v2084_v35 = vadd.f32 %v2083_v53, %v2082_v33 }
 0x687   : > { %v2085_v40 = vpop.f32.mrb[12].mxu0  ;;  %1705 = vxpose.xlu1.b32.cont [5/16] (narrow) %v2084_v35, 32 }
 0x688   : > { %v2086_v38 = vpop.f32.mrb[13].mxu0 }
 0x689   : > { %v2087_v1 = vadd.f32 %v2086_v38, %v2085_v40 }
 0x68b   : > { %v2088_v54 = vpop.f32.mrb[14].mxu0  ;;  %1706 = vxpose.xlu1.b32.cont [6/16] (narrow) %v2087_v1, 32 }
 0x68c   : > { %v2089_v58 = vpop.f32.mrb[15].mxu0 }
 0x68d   : > { %v2090_v42 = vadd.f32 %v2089_v58, %v2088_v54 }
 0x68f   : > { %v2091_v36 = vpop.f32.mrb[16].mxu0  ;;  %1707 = vxpose.xlu1.b32.cont [7/16] (narrow) %v2090_v42, 32 }
 0x690   : > { %2562 = shalt.err (!%p2559_p8)
}
 0x691   : > { %s2563_s29 = scalar_lea.hbm %s3447_s23, 4096  ;;  %s2567_s14 = scalar_lea.hbm %s3612_s30, 16384 }
 0x692   : > { %p2564_p11 = scmp.ne.s32.totalorder %s3447_s23, %s2563_s29  ;;  %p2568_p9 = scmp.lt.u32.totalorder %s3447_s23, %s3612_s30 }
 0x693   : > { %p2569_p1 = scmp.lt.u32.totalorder %s2567_s14, %s2563_s29  ;;  %p2571_p4 = scmp.lt.u32.totalorder %s2563_s29, %s3447_s23 }
 0x694   : > { %p2565_p13 = pnand %p2564_p11, %p3613_p2 }
 0x695   : > { %p2570_p5 = por %p2569_p1, %p2568_p9 }
 0x696   : > { %p2566_p7 = pneg %p2565_p13 }
 0x697   : > { %p2572_p12 = por %p2571_p4, %p2570_p5 }
 0x699   : > { %p2573_p3 = pnand %p2572_p12, %p2566_p7 }
 0x69b   : > { %2576 = shalt.err (!%p2573_p3)
}
 0x69c   : > { %s2720_s0 = smov 256   ;;  %s2721_s25 = smov 16   ;;  %v2092_v39 = vpop.f32.mrb[17].mxu0  ;;  %v2487_v2 = vld [vmem:[%s3113_s3] sm:$0xff]  ;;  %v2488_v5 = vld [vmem:[%s3113_s3 + $0x10] sm:$0xff] }
 0x69d   : > { %2266 = dma.vmem_to_hbm [thread:$0]  (%p3613_p2), %s3449_s26, 4096, %s3447_s23, %s1752_s27, %s2720_s0, %s2720_s0, %s2721_s25   ;;  %v2093_v12 = vadd.f32 %v2092_v39, %v2091_v36  ;;  %v2094_v45 = vpop.f32.mrb[18].mxu0 }
 0x69e   : > { %v2095_v37 = vpop.f32.mrb[19].mxu0  ;;  %s1700_s26 = sld [smem:[#allocation4]]  ;;  %s1987_s23 = sshll.u32 %s3610_s28, 3  ;;  %v2489_v44 = vld [vmem:[%s3113_s3 + $0x20] sm:$0xff]  ;;  %v2490_v23 = vld [vmem:[%s3113_s3 + $0x30] sm:$0xff] }
 0x69f   : > { %1708 = vxpose.xlu1.b32.cont [8/16] (narrow) %v2093_v12, 32  ;;  %v2096_v43 = vadd.f32 %v2095_v37, %v2094_v45  ;;  %v2097_v18 = vpop.f32.mrb[20].mxu0  ;;  %s1763_s27 = sadd.s32 %s2691_s7, %s1987_s23  ;;  %s1766_s24 = sshll.u32 %s2976_s21, 4  ;;  %s3491_s24 = int_to_ptr.vmem [resolvable:$true] %s1766_s24 }
 0x6a0   : > { %v2098_v48 = vpop.f32.mrb[21].mxu0  ;;  %s1988_s29 = sshll.u32 %s1763_s27, 7  ;;  %s3614_s28 = sld [smem:[#allocation26_spill]] }
 0x6a1   : > { %v2099_v4 = vadd.f32 %v2098_v48, %v2097_v18  ;;  %v2100_v46 = vpop.f32.mrb[22].mxu0  ;;  %s1747_s7 = scalar_lea.sflag [#allocation7], %s2972_s9  ;;  %s2577_s8 = scalar_lea.vmem %s3491_s24, 512 }
 0x6a2   : > { %v2101_v27 = vpop.f32.mrb[23].mxu0  ;;  %p2578_p6 = scmp.ne.s32.totalorder %s3491_s24, %s2577_s8  ;;  %s2722_s25 = smov [#allocation10]  }
 0x6a3   : > { %1709 = vxpose.xlu1.b32.cont [9/16] (narrow) %v2096_v43, 32  ;;  %v2102_v25 = vadd.f32 %v2101_v27, %v2100_v46  ;;  %v2103_v41 = vpop.f32.mrb[24].mxu0  ;;  %v2106_v49 = vpop.f32.mrb[32].mxu1 }
 0x6a4   : > { %v2104_v56 = vpop.f32.mrb[25].mxu0  ;;  %v2107_v57 = vpop.f32.mrb[33].mxu1  ;;  %v1733_v30 = vstv %s1700_s26  ;;  %p2579_p10 = pnand %p2578_p6, %p3613_p2  ;;  %s2581_s26 = sshll.u32 %s2722_s25, 4  ;;  %s2582_s26 = int_to_ptr.vmem [resolvable:$false] %s2581_s26 }
 0x6a5   : > { %v2105_v55 = vadd.f32 %v2104_v56, %v2103_v41  ;;  %v2108_v62 = vadd.f32 %v2107_v57, %v2106_v49  ;;  %s2583_s23 = scalar_lea.vmem %s2582_s26, 1024  ;;  %p2584_p8 = scmp.lt.s32.totalorder %s3491_s24, %s2582_s26 }
 0x6a6   : > { %s3489_s11 = scalar_lea.hbm %s3614_s28, %s1988_s29  ;;  %p2580_p0 = pneg %p2579_p10 }
 0x6a7   : > { %1710 = vxpose.xlu1.b32.cont [10/16] (narrow) %v2099_v4, 32  ;;  %v2109_v17 = vpop.f32.mrb[34].mxu1  ;;  %p2585_p11 = scmp.lt.s32.totalorder %s2583_s23, %s2577_s8 }
 0x6a8   : > { %v2110_v15 = vpop.f32.mrb[35].mxu1 }
 0x6a9   : > { %v2111_v7 = vadd.f32 %v2110_v15, %v2109_v17  ;;  %p2586_p13 = por %p2585_p11, %p2584_p8 }
 0x6ab   : > { %1711 = vxpose.xlu1.b32.cont [11/16] (narrow) %v2102_v25, 32  ;;  %v2112_v0 = vpop.f32.mrb[36].mxu1  ;;  %p2587_p7 = pnand %p2586_p13, %p2580_p0 }
 0x6ac   : > { %v2113_v51 = vpop.f32.mrb[37].mxu1 }
 0x6ad   : > { %v2114_v21 = vadd.f32 %v2113_v51, %v2112_v0 }
 0x6af   : > { %1712 = vxpose.xlu1.b32.cont [12/16] (narrow) %v2105_v55, 32  ;;  %v2115_v3 = vpop.f32.mrb[38].mxu1 }
 0x6b0   : > { %v2116_v6 = vpop.f32.mrb[39].mxu1 }
 0x6b1   : > { %v2117_v26 = vadd.f32 %v2116_v6, %v2115_v3 }
 0x6b3   : > { %1713 = vxpose.xlu1.b32.cont [13/16] (narrow) %v2108_v62, 32 }
 0x6b7   : > { %1714 = vxpose.xlu1.b32.cont [14/16] (narrow) %v2111_v7, 32 }
 0x6bb   : > { %1715 = vxpose.xlu1.b32.cont [15/16] (narrow) %v2114_v21, 32 }
 0x6bf   : > { %1716 = vxpose.xlu1.b32.end [16/16] (narrow) %v2117_v26, 32 }
 0x703   : > { %v1717_v11 = vpop.trf.xlu1 }
 0x704   : > { %v1734_v47 = vmul.f32 %v1733_v30, %v1717_v11 }
 0x706   : > { %v1738_v34 = vadd.f32 %v2487_v2, %v1734_v47 }
 0x707   : > { %v1718_v61 = vpop.trf.xlu1 }
 0x708   : > { %1742 = vst [vmem:[%s2976_s21] sm:$0xff] %v1738_v34  ;;  %v1735_v19 = vmul.f32 %v1733_v30, %v1718_v61 }
 0x70a   : > { %v1739_v52 = vadd.f32 %v2488_v5, %v1735_v19 }
 0x70b   : > { %v1719_v20 = vpop.trf.xlu1 }
 0x70c   : > { %1743 = vst [vmem:[%s2976_s21 + $0x8] sm:$0xff] %v1739_v52  ;;  %v1736_v8 = vmul.f32 %v1733_v30, %v1719_v20 }
 0x70e   : > { %v1740_v22 = vadd.f32 %v2489_v44, %v1736_v8 }
 0x70f   : > { %v1720_v50 = vpop.trf.xlu1 }
 0x710   : > { %1744 = vst [vmem:[%s2976_s21 + $0x10] sm:$0xff] %v1740_v22  ;;  %v1737_v10 = vmul.f32 %v1733_v30, %v1720_v50 }
 0x712   : > { %v1741_v9 = vadd.f32 %v2490_v23, %v1737_v10 }
 0x714   : > { %1745 = vst [vmem:[%s2976_s21 + $0x18] sm:$0xff] %v1741_v9 }
 0x715   : > { %2590 = shalt.err (!%p2587_p7)
}
 0x716   : > { %s2591_s21 = scalar_lea.hbm %s3489_s11, 512  ;;  %s2595_s29 = scalar_lea.hbm %s3614_s28, 2048 }
 0x717   : > { %p2592_p9 = scmp.ne.s32.totalorder %s3489_s11, %s2591_s21  ;;  %p2596_p4 = scmp.lt.u32.totalorder %s3489_s11, %s3614_s28 }
 0x718   : > { %p2597_p12 = scmp.lt.u32.totalorder %s2595_s29, %s2591_s21  ;;  %p2599_p6 = scmp.lt.u32.totalorder %s2591_s21, %s3489_s11 }
 0x719   : > { %p2593_p1 = pnand %p2592_p9, %p3613_p2 }
 0x71a   : > { %p2598_p3 = por %p2597_p12, %p2596_p4 }
 0x71b   : > { %p2594_p5 = pneg %p2593_p1 }
 0x71c   : > { %p2600_p10 = por %p2599_p6, %p2598_p3 }
 0x71e   : > { %p2601_p0 = pnand %p2600_p10, %p2594_p5 }
 0x720   : > { %2604 = shalt.err (!%p2601_p0)
}
 0x721   : > { %s2723_s8 = smov 128   ;;  %s2724_s25 = smov 8  }
 0x722   : > { %2265 = dma.vmem_to_hbm [thread:$0]  (%p3613_p2), %s3491_s24, 512, %s3489_s11, %s1747_s7, %s2723_s8, %s2720_s0, %s2724_s25  }
 0x723 PF: > { %s3615_s26 = sld [smem:[#allocation20_spill]]  ;;  %s3616_s23 = sld [smem:[#allocation17_spill]] }
 0x724   : > { %s3617_s3 = sld [smem:[#allocation22_spill]] }
 0x729   : > { %p2287_p8 = scmp.ge.s32.totalorder %s3615_s26, 2  ;;  %s1800_s27 = sand.u32 1, %s3616_s23  }
 0x72a   : > { %p3618_p11 = scmp.ne.s32.totalorder %s3617_s3, 0  ;;  %s1801_s21 = scalar_lea.sflag [#allocation7], %s1800_s27 }
 0x72c   : > { %p2278_p13 = pnand %p2287_p8, %p3618_p11 }
 0x72e   : > { %2658 = dma.done.wait (!%p2278_p13), %s1801_s21, 512  }
 0x72f   : > { %2660 = vsyncadd (!%p2278_p13), %s1801_s21, 4294966784  ;;  %s1810_s29 = scalar_lea.sflag [#allocation12], %s1800_s27 }
 0x730   : > { %2662 = dma.done.wait (!%p2278_p13), %s1810_s29, 4096  }
 0x731   : > { %2664 = vsyncadd (!%p2278_p13), %s1810_s29, 4294963200  ;;  %s31_s22 = sadd.s32 1, %s3615_s26   ;;  %s3619_s7 = sld [smem:[#allocation19_spill]] }
 0x732   : > { %p28_p7 = scmp.ge.s32.totalorder %s31_s22, 6   ;;  %s3620_s9 = sld [smem:[#allocation23_spill]] }
 0x733   : > { %s3621_s11 = smov %s2671_s12  ;;  %s3622_s12 = smov %s2675_s13 }
 0x734   : > { %s3623_s13 = smov %s2928_s18  ;;  %s3624_s14 = smov %s2683_s15 }
 0x735   : > { %s3625_s15 = smov %s2687_s16  ;;  %s3626_s16 = smov %s2925_s10 }
 0x736   : > { %s3627_s17 = smov %s2703_s19  ;;  %s3629_s19 = smov %s3636_s20 }
 0x737   : > { %s3630_s20 = smov %s31_s22  ;;  %30 = sbr.rel (!%p28_p7) target bundleno = 18 (0x12), region = 123 }
 0x738   : > { %s3628_s18 = smov %s3620_s9 }
 0x73e   :  { %1815 = vsyncpa [#allocation6], 1 }
 0x73f   :  { %1817 = vsyncpa [#allocation6 + $0x1], 1 }
 0x740   :  { %1818 = vsyncpa [#allocation9], 1 }
 0x741   :  { %1819 = vsyncpa [#allocation7], 1 }
 0x742   :  { %1821 = vsyncpa [#allocation7 + $0x1], 1 }
 0x743   :  { %1822 = vsyncpa [#allocation12], 1 }
 0x744   :  { %1824 = vsyncpa [#allocation12 + $0x1], 1 }

</bundles_post_ra>
